<compile_context>
chip_gen: v6e
topology: v6e:2x2x1
jax: 0.10.0
libtpu: 0.0.40
codegen_flags: <defaults>
</compile_context>

<pallas_src>
import jax
import jax.numpy as jnp
from jax.experimental import pallas as pl
from jax.experimental.pallas import tpu as pltpu


def _leaky(v, slope=0.2):
    # LeakyReLU(0.2): max(x, 0.2*x) == x for x>=0, 0.2*x for x<0 (slope in (0,1))
    return jnp.maximum(v, slope * v)


def dgcn_kernel(xt_ref, w_adj_ref, w_sw_t_ref, b_sw_ref,
                w_glb_t_ref, b_glb_ref,
                w_co_x_t_ref, w_co_g_t_ref, b_co_ref,
                w_dyn_t_ref, b_dyn_ref, out_ref):
    f32 = jnp.float32
    cdt = w_adj_ref.dtype                       # MXU compute dtype (bf16 or f32)

    xt = xt_ref[...]                            # (TB, N, C) == x^T block, already in cdt
    TB, N, C = xt.shape
    Co = w_sw_t_ref.shape[1]

    # ---------------- static GCN ----------------
    # static_adj: Conv1d(N, N, 1, bias=False) over the node axis. The (N, N) weight is
    # shared across the batch: run TB small (N,N)@(N,C) matmuls with the weight held
    # resident instead of materializing a broadcast_to((TB,N,N)) copy every grid step.
    w_adj = w_adj_ref[...]
    tt = _leaky(jnp.concatenate(
        [jnp.dot(w_adj, xt[b], preferred_element_type=f32) for b in range(TB)],
        axis=0))                                                          # (TB*N, C) f32
    # static_weight: Conv1d(C, Co, 1) as one wide matmul over the stacked batch
    st = _leaky(jnp.dot(tt.astype(cdt), w_sw_t_ref[...],
                        preferred_element_type=f32) + b_sw_ref[...])      # (TB*N, Co)
    xrt = xt.astype(f32) + st.reshape(TB, N, Co)   # residual (requires Co == C)

    # ---------------- dynamic adjacency ----------------
    g = jnp.mean(xrt, axis=1)                                             # gap -> (TB, C)
    xrt_c = xrt.astype(cdt)          # only MXU consumers remain; drop the f32 copy here
    # conv_global + BatchNorm1d(eval) folded into one affine matmul
    gg = _leaky(jnp.dot(g.astype(cdt), w_glb_t_ref[...],
                        preferred_element_type=f32) + b_glb_ref[...])     # (TB, C)
    # conv_create_co_mat with split weights (no concat / broadcast materialization):
    # d_adj[b, q, p] == sigmoid( w_co_x[p,:]·xr[b,:,q] + w_co_g[p,:]·gg[b,:] + b_co[p] )
    t_node = jnp.dot(xrt_c.reshape(TB * N, C), w_co_x_t_ref[...],
                     preferred_element_type=f32).reshape(TB, N, N)        # (TB, N, N)
    t_glb = jnp.dot(gg.astype(cdt), w_co_g_t_ref[...],
                    preferred_element_type=f32)                           # (TB, N)
    d_adj = jax.nn.sigmoid(t_node + t_glb[:, None, :] + b_co_ref[...])    # (TB, N, N)

    # ---------------- dynamic GCN ----------------
    # y^T[b, q, c] = sum_p dynamic_adj[b, p, q] * xr[b, c, p]
    yt = _leaky(jnp.einsum('bqp,bpc->bqc', d_adj.astype(cdt), xrt_c,
                           preferred_element_type=f32)).astype(cdt)       # (TB, N, C)
    ot = _leaky(jnp.dot(yt.reshape(TB * N, C), w_dyn_t_ref[...],
                        preferred_element_type=f32) + b_dyn_ref[...])     # (TB*N, Co)
    out_ref[...] = ot.reshape(TB, N, Co).astype(out_ref.dtype)


def _prepare_kernel_params(p, compute_dtype):
    """Fold BN, split w_co, pre-transpose weights for the (node, channel) layout."""
    f32 = jnp.float32
    C = p["w_glb"].shape[0]
    eps = 1e-5
    bn_scale = p["gamma"] / jnp.sqrt(p["running_var"] + eps)
    bn_bias = p["beta"] - p["running_mean"] * bn_scale
    w_glb_fold = p["w_glb"] * bn_scale[:, None]          # scale conv_global out-channels
    b_glb_fold = bn_scale * p["b_glb"] + bn_bias
    w_co_g = p["w_co"][:, :C]                            # half acting on the global feat
    w_co_x = p["w_co"][:, C:]                            # half acting on per-node feats
    return {
        "w_adj":    p["w_adj"].astype(compute_dtype),                  # (N, N)
        "w_sw_t":   p["w_sw"].T.astype(compute_dtype),                 # (C, Co)
        "b_sw":     p["b_sw"].reshape(1, -1).astype(f32),              # (1, Co) lane-dense
        "w_glb_t":  w_glb_fold.T.astype(compute_dtype),                # (C, C)
        "b_glb":    b_glb_fold.reshape(1, -1).astype(f32),             # (1, C)
        "w_co_x_t": w_co_x.T.astype(compute_dtype),                    # (C, N)
        "w_co_g_t": w_co_g.T.astype(compute_dtype),                    # (C, N)
        "b_co":     p["b_co"].reshape(1, -1).astype(f32),              # (1, N)
        "w_dyn_t":  p["w_dyn"].T.astype(compute_dtype),                # (C, Co)
        "b_dyn":    p["b_dyn"].reshape(1, -1).astype(f32),             # (1, Co)
    }


def dynamic_graph_convolution(x, params, *, compute_dtype=jnp.bfloat16, batch_block=8,
                              vmem_limit_bytes=None,
                              x_channels_last=False, out_channels_last=False):
    """x: (B, C, N) -> (B, Cout, N), matching the PyTorch module's forward.

    Set x_channels_last / out_channels_last to work directly in (B, N, C) and skip the
    host-side layout transposes (each is a full HBM read+write of the tensor).
    batch_block guidance at C=1024: ~16 on v5e/v6e (128 MiB VMEM), ~4 on v7x (64 MiB).
    """
    N = params["w_adj"].shape[0]
    C = params["w_sw"].shape[1]
    Co = params["w_dyn"].shape[0]
    # Residual `x + static(x)` requires out_features == in_features.
    assert params["w_sw"].shape[0] == Co and Co == C, \
        "DynamicGraphConvolution residual requires out_features == in_features"

    if x_channels_last:
        B, n_x, c_x = x.shape
    else:
        B, c_x, n_x = x.shape
    assert c_x == C and n_x == N, "x shape inconsistent with params"

    kp = _prepare_kernel_params(params, compute_dtype)

    # Batch blocking: keep >= 2 grid steps when B >= 2 so the "parallel" batch axis
    # actually shards across both TensorCores on v7x; pad B up to a multiple of TB
    # instead of degrading to TB=1 when B has no convenient divisor.
    tb = max(1, min(batch_block, pl.cdiv(B, 2)))
    Bp = pl.cdiv(B, tb) * tb

    xt = x if x_channels_last else jnp.transpose(x, (0, 2, 1))   # (B, N, C)
    xt = xt.astype(compute_dtype)     # bf16 x blocks: halves the x DMA / VMEM footprint
    if Bp != B:
        xt = jnp.pad(xt, ((0, Bp - B), (0, 0), (0, 0)))

    # ---- VMEM budget (explicit; the default ~32 MiB scoped limit is too small at
    #      realistic ADD-GCN sizes, e.g. C=1024, N=80) ----
    c_item = jnp.dtype(compute_dtype).itemsize
    o_item = jnp.dtype(x.dtype).itemsize
    weight_bytes = (N * N + 2 * C * Co + C * C + 2 * C * N) * c_item \
                   + (2 * Co + C + N) * 4
    io_bytes = 2 * tb * N * C * c_item + 2 * tb * N * Co * o_item     # double-buffered
    temp_bytes = 5 * tb * N * max(C, Co) * 4 + 2 * tb * N * N * 4     # live f32 temps
    if vmem_limit_bytes is None:
        vmem_limit_bytes = min(
            max(int(1.5 * (2 * weight_bytes + io_bytes + temp_bytes)), 32 * 1024 * 1024),
            100 * 1024 * 1024)

    flops = 2 * Bp * (3 * N * N * C + 2 * N * C * Co + C * C + C * N)
    cost = pl.CostEstimate(
        flops=int(flops),
        transcendentals=int(Bp * N * N),                              # sigmoid
        bytes_accessed=int(Bp * N * C * c_item + Bp * N * Co * o_item + weight_bytes))

    def _call(weight_pipeline_mode):
        kw = {} if weight_pipeline_mode is None else {"pipeline_mode": weight_pipeline_mode}

        def wfull(shape):   # grid-invariant weight/bias block (whole array in VMEM)
            return pl.BlockSpec(shape, lambda i, _n=len(shape): (0,) * _n, **kw)

        in_specs = [
            pl.BlockSpec((tb, N, C), lambda i: (i, 0, 0)),   # x^T, batch-blocked
            wfull((N, N)),        # w_adj
            wfull((C, Co)),       # w_sw^T
            wfull((1, Co)),       # b_sw (row)
            wfull((C, C)),        # folded conv_global/BN weight ^T
            wfull((1, C)),        # folded conv_global/BN bias (row)
            wfull((C, N)),        # w_co_x^T
            wfull((C, N)),        # w_co_g^T
            wfull((1, N)),        # b_co (row)
            wfull((C, Co)),       # w_dyn^T
            wfull((1, Co)),       # b_dyn (row)
        ]
        out_specs = pl.BlockSpec((tb, N, Co), lambda i: (i, 0, 0))

        return pl.pallas_call(
            dgcn_kernel,
            out_shape=jax.ShapeDtypeStruct((Bp, N, Co), x.dtype),
            grid_spec=pltpu.PrefetchScalarGridSpec(
                num_scalar_prefetch=0,
                grid=(Bp // tb,),
                in_specs=in_specs,
                out_specs=out_specs,
            ),
            compiler_params=pltpu.CompilerParams(
                dimension_semantics=("parallel",),          # batch blocks are independent
                vmem_limit_bytes=int(vmem_limit_bytes)),
            cost_estimate=cost,
        )(xt, kp["w_adj"], kp["w_sw_t"], kp["b_sw"], kp["w_glb_t"], kp["b_glb"],
          kp["w_co_x_t"], kp["w_co_g_t"], kp["b_co"], kp["w_dyn_t"], kp["b_dyn"])

    try:
        # Weights/biases are identical at every grid step: single-buffer them so Pallas
        # does not allocate a second (useless) VMEM buffer for each.
        out_t = _call(pl.Buffered(1))
    except Exception:
        # TODO(synk): some jax versions reject Buffered(1) on TPU; fall back to the
        # default double-buffered pipelining (only costs extra VMEM).
        out_t = _call(None)

    out_t = out_t[:B]                                     # drop batch padding
    return out_t if out_channels_last else jnp.transpose(out_t, (0, 2, 1))


def init_params(key, in_features, out_features, num_nodes, dtype=jnp.float32):
    C, Co, N = in_features, out_features, num_nodes
    ks = jax.random.split(key, 13)
    s = 0.1
    return {
        "w_adj": s * jax.random.normal(ks[0], (N, N), dtype),        # Conv1d(N, N, 1, bias=False)
        "w_sw":  s * jax.random.normal(ks[1], (Co, C), dtype),       # Conv1d(C, Co, 1)
        "b_sw":  s * jax.random.normal(ks[2], (Co,), dtype),
        "w_glb": s * jax.random.normal(ks[3], (C, C), dtype),        # Conv1d(C, C, 1)
        "b_glb": s * jax.random.normal(ks[4], (C,), dtype),
        "w_co":  s * jax.random.normal(ks[5], (N, 2 * C), dtype),    # Conv1d(2C, N, 1)
        "b_co":  s * jax.random.normal(ks[6], (N,), dtype),
        "w_dyn": s * jax.random.normal(ks[7], (Co, C), dtype),       # Conv1d(C, Co, 1)
        "b_dyn": s * jax.random.normal(ks[8], (Co,), dtype),
        # BatchNorm1d(C) eval-mode buffers (randomized so the BN fold is exercised)
        "gamma":        1.0 + 0.1 * jax.random.normal(ks[9], (C,), dtype),
        "beta":         0.1 * jax.random.normal(ks[10], (C,), dtype),
        "running_mean": 0.1 * jax.random.normal(ks[11], (C,), dtype),
        "running_var":  0.5 + jnp.abs(0.5 * jax.random.normal(ks[12], (C,), dtype)),
    }


def reference(x, p, eps=1e-5):
    """Pure-JAX f32 mirror of the PyTorch forward (eval-mode BatchNorm)."""
    leaky = lambda v: jnp.where(v >= 0, v, 0.2 * v)
    # static gcn
    t = leaky(jnp.einsum('bcn,mn->bcm', x, p["w_adj"]))
    s = leaky(jnp.einsum('oc,bcm->bom', p["w_sw"], t) + p["b_sw"][None, :, None])
    xr = x + s
    # dynamic adjacency
    g = jnp.mean(xr, axis=2, keepdims=True)
    g = jnp.einsum('oc,bcz->boz', p["w_glb"], g) + p["b_glb"][None, :, None]
    scale = p["gamma"] / jnp.sqrt(p["running_var"] + eps)
    bias = p["beta"] - p["running_mean"] * scale
    g = leaky(g * scale[None, :, None] + bias[None, :, None])
    g = jnp.broadcast_to(g, xr.shape)
    cat = jnp.concatenate([g, xr], axis=1)
    adj = jax.nn.sigmoid(jnp.einsum('nk,bkm->bnm', p["w_co"], cat)
                         + p["b_co"][None, :, None])
    # dynamic gcn
    y = leaky(jnp.einsum('bcn,bnm->bcm', xr, adj))
    o = leaky(jnp.einsum('oc,bcm->bom', p["w_dyn"], y) + p["b_dyn"][None, :, None])
    return o


if __name__ == "__main__":
    B, in_features, out_features, num_nodes = 4, 32, 32, 8
    key = jax.random.PRNGKey(0)
    k_x, k_p = jax.random.split(key)
    x = jax.random.normal(k_x, (B, in_features, num_nodes), jnp.float32)
    params = init_params(k_p, in_features, out_features, num_nodes)

    ref = jax.block_until_ready(reference(x, params))

    # f32 compute path: verifies the transposed / folded / split-weight math exactly.
    out_f32 = jax.block_until_ready(
        dynamic_graph_convolution(x, params, compute_dtype=jnp.float32))
    assert out_f32.shape == (B, out_features, num_nodes)
    assert jnp.allclose(out_f32, ref, atol=5e-4, rtol=5e-4), "f32 kernel mismatch vs reference"

    # bf16 MXU path (default): bf16 operands / input blocks with f32 accumulation.
    out_bf16 = jax.block_until_ready(dynamic_graph_convolution(x, params))
    rel_err = jnp.max(jnp.abs(out_bf16 - ref)) / (jnp.max(jnp.abs(ref)) + 1e-6)
    assert rel_err < 5e-2, f"bf16 kernel mismatch vs reference (rel_err={rel_err})"

    # odd batch exercises the pad-to-multiple-of-TB path (no TB=1 degradation).
    x3 = x[:3]
    ref3 = reference(x3, params)
    out3 = jax.block_until_ready(dynamic_graph_convolution(x3, params))
    assert out3.shape == (3, out_features, num_nodes)
    rel3 = jnp.max(jnp.abs(out3 - ref3)) / (jnp.max(jnp.abs(ref3)) + 1e-6)
    assert rel3 < 5e-2, f"padded-batch kernel mismatch vs reference (rel_err={rel3})"

    print("KERNEL_OK")
</pallas_src>

<mosaic_0001>
module attributes {stable_mosaic.version = 11 : i64} {
  func.func @dgcn_kernel(%arg0: i32, %arg1: memref<2x8x32xf32, #tpu.memory_space<vmem>>, %arg2: memref<8x8xf32, #tpu.memory_space<vmem>>, %arg3: memref<32x32xf32, #tpu.memory_space<vmem>>, %arg4: memref<1x32xf32, #tpu.memory_space<vmem>>, %arg5: memref<32x32xf32, #tpu.memory_space<vmem>>, %arg6: memref<1x32xf32, #tpu.memory_space<vmem>>, %arg7: memref<32x8xf32, #tpu.memory_space<vmem>>, %arg8: memref<32x8xf32, #tpu.memory_space<vmem>>, %arg9: memref<1x8xf32, #tpu.memory_space<vmem>>, %arg10: memref<32x32xf32, #tpu.memory_space<vmem>>, %arg11: memref<1x32xf32, #tpu.memory_space<vmem>>, %arg12: memref<2x8x32xf32, #tpu.memory_space<vmem>>) attributes {dimension_semantics = [#tpu.dimension_semantics<parallel>], iteration_bounds = array<i64: 2>, scalar_prefetch = 0 : i64, scratch_operands = 0 : i64, tpu.core_type = #tpu.core_type<tc>, window_params = [{transform_indices = @transform_0, window_bounds = array<i64: 2, 8, 32>}, {pipeline_mode = #tpu.pipeline_mode<synchronous>, transform_indices = @transform_1, window_bounds = array<i64: 8, 8>}, {pipeline_mode = #tpu.pipeline_mode<synchronous>, transform_indices = @transform_2, window_bounds = array<i64: 32, 32>}, {pipeline_mode = #tpu.pipeline_mode<synchronous>, transform_indices = @transform_3, window_bounds = array<i64: 1, 32>}, {pipeline_mode = #tpu.pipeline_mode<synchronous>, transform_indices = @transform_4, window_bounds = array<i64: 32, 32>}, {pipeline_mode = #tpu.pipeline_mode<synchronous>, transform_indices = @transform_5, window_bounds = array<i64: 1, 32>}, {pipeline_mode = #tpu.pipeline_mode<synchronous>, transform_indices = @transform_6, window_bounds = array<i64: 32, 8>}, {pipeline_mode = #tpu.pipeline_mode<synchronous>, transform_indices = @transform_7, window_bounds = array<i64: 32, 8>}, {pipeline_mode = #tpu.pipeline_mode<synchronous>, transform_indices = @transform_8, window_bounds = array<i64: 1, 8>}, {pipeline_mode = #tpu.pipeline_mode<synchronous>, transform_indices = @transform_9, window_bounds = array<i64: 32, 32>}, {pipeline_mode = #tpu.pipeline_mode<synchronous>, transform_indices = @transform_10, window_bounds = array<i64: 1, 32>}, {transform_indices = @transform_11, window_bounds = array<i64: 2, 8, 32>}]} {
    %c0 = arith.constant 0 : index
    %c0_0 = arith.constant 0 : index
    %c0_1 = arith.constant 0 : index
    %0 = vector.load %arg1[%c0, %c0_0, %c0_1] : memref<2x8x32xf32, #tpu.memory_space<vmem>>, vector<2x8x32xf32>
    %c0_2 = arith.constant 0 : index
    %c0_3 = arith.constant 0 : index
    %1 = vector.load %arg2[%c0_2, %c0_3] : memref<8x8xf32, #tpu.memory_space<vmem>>, vector<8x8xf32>
    %2 = vector.extract_strided_slice %0 {offsets = [0, 0, 0], sizes = [1, 8, 32], strides = [1, 1, 1]} : vector<2x8x32xf32> to vector<1x8x32xf32>
    %3 = vector.shape_cast %2 : vector<1x8x32xf32> to vector<8x32xf32>
    %cst = arith.constant dense<0.000000e+00> : vector<8x32xf32>
    %4 = tpu.matmul %1, %3, %cst {dimension_numbers = #tpu.dot_dimension_numbers<[1], [0], [0], [1], [0, 0, 1, 1], [], []>} : vector<8x8xf32>, vector<8x32xf32>, vector<8x32xf32> -> vector<8x32xf32>
    %5 = vector.extract_strided_slice %0 {offsets = [1, 0, 0], sizes = [1, 8, 32], strides = [1, 1, 1]} : vector<2x8x32xf32> to vector<1x8x32xf32>
    %6 = vector.shape_cast %5 : vector<1x8x32xf32> to vector<8x32xf32>
    %cst_4 = arith.constant dense<0.000000e+00> : vector<8x32xf32>
    %7 = tpu.matmul %1, %6, %cst_4 {dimension_numbers = #tpu.dot_dimension_numbers<[1], [0], [0], [1], [0, 0, 1, 1], [], []>} : vector<8x8xf32>, vector<8x32xf32>, vector<8x32xf32> -> vector<8x32xf32>
    %8 = tpu.concatenate %4, %7 in 0 : vector<8x32xf32>, vector<8x32xf32> -> vector<16x32xf32>
    %cst_5 = arith.constant 2.000000e-01 : f32
    %9 = vector.broadcast %cst_5 : f32 to vector<16x32xf32>
    %10 = arith.mulf %9, %8 : vector<16x32xf32>
    %11 = arith.maximumf %8, %10 : vector<16x32xf32>
    %c0_6 = arith.constant 0 : index
    %c0_7 = arith.constant 0 : index
    %12 = vector.load %arg3[%c0_6, %c0_7] : memref<32x32xf32, #tpu.memory_space<vmem>>, vector<32x32xf32>
    %cst_8 = arith.constant dense<0.000000e+00> : vector<16x32xf32>
    %13 = tpu.matmul %11, %12, %cst_8 {dimension_numbers = #tpu.dot_dimension_numbers<[1], [0], [0], [1], [0, 0, 1, 1], [], []>} : vector<16x32xf32>, vector<32x32xf32>, vector<16x32xf32> -> vector<16x32xf32>
    %c0_9 = arith.constant 0 : index
    %c0_10 = arith.constant 0 : index
    %14 = vector.load %arg4[%c0_9, %c0_10] : memref<1x32xf32, #tpu.memory_space<vmem>>, vector<1x32xf32>
    %15 = vector.broadcast %14 : vector<1x32xf32> to vector<16x32xf32>
    %16 = arith.addf %13, %15 : vector<16x32xf32>
    %cst_11 = arith.constant 2.000000e-01 : f32
    %17 = vector.broadcast %cst_11 : f32 to vector<16x32xf32>
    %18 = arith.mulf %17, %16 : vector<16x32xf32>
    %19 = arith.maximumf %16, %18 : vector<16x32xf32>
    %20 = vector.shape_cast %19 : vector<16x32xf32> to vector<2x8x32xf32>
    %21 = arith.addf %0, %20 : vector<2x8x32xf32>
    %cst_12 = arith.constant dense<0.000000e+00> : vector<2x32xf32>
    %22 = vector.multi_reduction <add>, %21, %cst_12 [1] : vector<2x8x32xf32> to vector<2x32xf32>
    %cst_13 = arith.constant 8.000000e+00 : f32
    %23 = vector.broadcast %cst_13 : f32 to vector<2x32xf32>
    %24 = arith.divf %22, %23 : vector<2x32xf32>
    %c0_14 = arith.constant 0 : index
    %c0_15 = arith.constant 0 : index
    %25 = vector.load %arg5[%c0_14, %c0_15] : memref<32x32xf32, #tpu.memory_space<vmem>>, vector<32x32xf32>
    %cst_16 = arith.constant dense<0.000000e+00> : vector<2x32xf32>
    %26 = tpu.matmul %24, %25, %cst_16 {dimension_numbers = #tpu.dot_dimension_numbers<[1], [0], [0], [1], [0, 0, 1, 1], [], []>} : vector<2x32xf32>, vector<32x32xf32>, vector<2x32xf32> -> vector<2x32xf32>
    %c0_17 = arith.constant 0 : index
    %c0_18 = arith.constant 0 : index
    %27 = vector.load %arg6[%c0_17, %c0_18] : memref<1x32xf32, #tpu.memory_space<vmem>>, vector<1x32xf32>
    %28 = vector.broadcast %27 : vector<1x32xf32> to vector<2x32xf32>
    %29 = arith.addf %26, %28 : vector<2x32xf32>
    %cst_19 = arith.constant 2.000000e-01 : f32
    %30 = vector.broadcast %cst_19 : f32 to vector<2x32xf32>
    %31 = arith.mulf %30, %29 : vector<2x32xf32>
    %32 = arith.maximumf %29, %31 : vector<2x32xf32>
    %33 = vector.shape_cast %21 : vector<2x8x32xf32> to vector<16x32xf32>
    %c0_20 = arith.constant 0 : index
    %c0_21 = arith.constant 0 : index
    %34 = vector.load %arg7[%c0_20, %c0_21] : memref<32x8xf32, #tpu.memory_space<vmem>>, vector<32x8xf32>
    %cst_22 = arith.constant dense<0.000000e+00> : vector<16x8xf32>
    %35 = tpu.matmul %33, %34, %cst_22 {dimension_numbers = #tpu.dot_dimension_numbers<[1], [0], [0], [1], [0, 0, 1, 1], [], []>} : vector<16x32xf32>, vector<32x8xf32>, vector<16x8xf32> -> vector<16x8xf32>
    %36 = vector.shape_cast %35 : vector<16x8xf32> to vector<2x8x8xf32>
    %c0_23 = arith.constant 0 : index
    %c0_24 = arith.constant 0 : index
    %37 = vector.load %arg8[%c0_23, %c0_24] : memref<32x8xf32, #tpu.memory_space<vmem>>, vector<32x8xf32>
    %cst_25 = arith.constant dense<0.000000e+00> : vector<2x8xf32>
    %38 = tpu.matmul %32, %37, %cst_25 {dimension_numbers = #tpu.dot_dimension_numbers<[1], [0], [0], [1], [0, 0, 1, 1], [], []>} : vector<2x32xf32>, vector<32x8xf32>, vector<2x8xf32> -> vector<2x8xf32>
    %39 = vector.shape_cast %38 : vector<2x8xf32> to vector<2x1x8xf32>
    %40 = vector.broadcast %39 : vector<2x1x8xf32> to vector<2x8x8xf32>
    %41 = arith.addf %36, %40 : vector<2x8x8xf32>
    %c0_26 = arith.constant 0 : index
    %c0_27 = arith.constant 0 : index
    %42 = vector.load %arg9[%c0_26, %c0_27] : memref<1x8xf32, #tpu.memory_space<vmem>>, vector<1x8xf32>
    %43 = vector.shape_cast %42 : vector<1x8xf32> to vector<1x1x8xf32>
    %44 = vector.broadcast %43 : vector<1x1x8xf32> to vector<2x8x8xf32>
    %45 = arith.addf %41, %44 : vector<2x8x8xf32>
    %46 = arith.negf %45 : vector<2x8x8xf32>
    %47 = math.exp %46 : vector<2x8x8xf32>
    %cst_28 = arith.constant 1.000000e+00 : f32
    %48 = vector.broadcast %cst_28 : f32 to vector<2x8x8xf32>
    %49 = arith.addf %48, %47 : vector<2x8x8xf32>
    %50 = arith.divf %48, %49 : vector<2x8x8xf32>
    "tpu.trace_start"() <{level = 10 : i32, message = "bqp,bpc->bqc"}> : () -> ()
    %cst_29 = arith.constant dense<0.000000e+00> : vector<2x8x32xf32>
    %51 = tpu.matmul %50, %21, %cst_29 {dimension_numbers = #tpu.dot_dimension_numbers<[2], [1], [1], [2], [0, 0, 0, 1, 1, 2], [0], [0]>} : vector<2x8x8xf32>, vector<2x8x32xf32>, vector<2x8x32xf32> -> vector<2x8x32xf32>
    "tpu.trace_stop"() : () -> ()
    %cst_30 = arith.constant 2.000000e-01 : f32
    %52 = vector.broadcast %cst_30 : f32 to vector<2x8x32xf32>
    %53 = arith.mulf %52, %51 : vector<2x8x32xf32>
    %54 = arith.maximumf %51, %53 : vector<2x8x32xf32>
    %55 = vector.shape_cast %54 : vector<2x8x32xf32> to vector<16x32xf32>
    %c0_31 = arith.constant 0 : index
    %c0_32 = arith.constant 0 : index
    %56 = vector.load %arg10[%c0_31, %c0_32] : memref<32x32xf32, #tpu.memory_space<vmem>>, vector<32x32xf32>
    %cst_33 = arith.constant dense<0.000000e+00> : vector<16x32xf32>
    %57 = tpu.matmul %55, %56, %cst_33 {dimension_numbers = #tpu.dot_dimension_numbers<[1], [0], [0], [1], [0, 0, 1, 1], [], []>} : vector<16x32xf32>, vector<32x32xf32>, vector<16x32xf32> -> vector<16x32xf32>
    %c0_34 = arith.constant 0 : index
    %c0_35 = arith.constant 0 : index
    %58 = vector.load %arg11[%c0_34, %c0_35] : memref<1x32xf32, #tpu.memory_space<vmem>>, vector<1x32xf32>
    %59 = vector.broadcast %58 : vector<1x32xf32> to vector<16x32xf32>
    %60 = arith.addf %57, %59 : vector<16x32xf32>
    %cst_36 = arith.constant 2.000000e-01 : f32
    %61 = vector.broadcast %cst_36 : f32 to vector<16x32xf32>
    %62 = arith.mulf %61, %60 : vector<16x32xf32>
    %63 = arith.maximumf %60, %62 : vector<16x32xf32>
    %64 = vector.shape_cast %63 : vector<16x32xf32> to vector<2x8x32xf32>
    %c0_37 = arith.constant 0 : index
    %c0_38 = arith.constant 0 : index
    %c0_39 = arith.constant 0 : index
    %65 = vector.load %arg12[%c0_37, %c0_38, %c0_39] : memref<2x8x32xf32, #tpu.memory_space<vmem>>, vector<2x8x32xf32>
    tpu.vector_store %arg12[%c0_37, %c0_38, %c0_39], %64 {strides = array<i32>} : memref<2x8x32xf32, #tpu.memory_space<vmem>>, vector<2x8x32xf32>,
    return
  }
  func.func @transform_0(%arg0: i32) -> (i32, i32, i32) {
    %c0_i32 = arith.constant 0 : i32
    %c0_i32_0 = arith.constant 0 : i32
    %c0_i32_1 = arith.constant 0 : i32
    return %arg0, %c0_i32, %c0_i32_0 : i32, i32, i32
  }
  func.func @transform_1(%arg0: i32) -> (i32, i32) {
    %c0_i32 = arith.constant 0 : i32
    %c0_i32_0 = arith.constant 0 : i32
    %c0_i32_1 = arith.constant 0 : i32
    return %c0_i32, %c0_i32_0 : i32, i32
  }
  func.func @transform_2(%arg0: i32) -> (i32, i32) {
    %c0_i32 = arith.constant 0 : i32
    %c0_i32_0 = arith.constant 0 : i32
    %c0_i32_1 = arith.constant 0 : i32
    return %c0_i32, %c0_i32_0 : i32, i32
  }
  func.func @transform_3(%arg0: i32) -> (i32, i32) {
    %c0_i32 = arith.constant 0 : i32
    %c0_i32_0 = arith.constant 0 : i32
    %c0_i32_1 = arith.constant 0 : i32
    return %c0_i32, %c0_i32_0 : i32, i32
  }
  func.func @transform_4(%arg0: i32) -> (i32, i32) {
    %c0_i32 = arith.constant 0 : i32
    %c0_i32_0 = arith.constant 0 : i32
    %c0_i32_1 = arith.constant 0 : i32
    return %c0_i32, %c0_i32_0 : i32, i32
  }
  func.func @transform_5(%arg0: i32) -> (i32, i32) {
    %c0_i32 = arith.constant 0 : i32
    %c0_i32_0 = arith.constant 0 : i32
    %c0_i32_1 = arith.constant 0 : i32
    return %c0_i32, %c0_i32_0 : i32, i32
  }
  func.func @transform_6(%arg0: i32) -> (i32, i32) {
    %c0_i32 = arith.constant 0 : i32
    %c0_i32_0 = arith.constant 0 : i32
    %c0_i32_1 = arith.constant 0 : i32
    return %c0_i32, %c0_i32_0 : i32, i32
  }
  func.func @transform_7(%arg0: i32) -> (i32, i32) {
    %c0_i32 = arith.constant 0 : i32
    %c0_i32_0 = arith.constant 0 : i32
    %c0_i32_1 = arith.constant 0 : i32
    return %c0_i32, %c0_i32_0 : i32, i32
  }
  func.func @transform_8(%arg0: i32) -> (i32, i32) {
    %c0_i32 = arith.constant 0 : i32
    %c0_i32_0 = arith.constant 0 : i32
    %c0_i32_1 = arith.constant 0 : i32
    return %c0_i32, %c0_i32_0 : i32, i32
  }
  func.func @transform_9(%arg0: i32) -> (i32, i32) {
    %c0_i32 = arith.constant 0 : i32
    %c0_i32_0 = arith.constant 0 : i32
    %c0_i32_1 = arith.constant 0 : i32
    return %c0_i32, %c0_i32_0 : i32, i32
  }
  func.func @transform_10(%arg0: i32) -> (i32, i32) {
    %c0_i32 = arith.constant 0 : i32
    %c0_i32_0 = arith.constant 0 : i32
    %c0_i32_1 = arith.constant 0 : i32
    return %c0_i32, %c0_i32_0 : i32, i32
  }
  func.func @transform_11(%arg0: i32) -> (i32, i32, i32) {
    %c0_i32 = arith.constant 0 : i32
    %c0_i32_0 = arith.constant 0 : i32
    %c0_i32_1 = arith.constant 0 : i32
    return %arg0, %c0_i32, %c0_i32_0 : i32, i32, i32
  }
}

module attributes {stable_mosaic.version = 11 : i64} {
  func.func @dgcn_kernel(%arg0: i32, %arg1: memref<2x8x32xf32, #tpu.memory_space<vmem>>, %arg2: memref<8x8xf32, #tpu.memory_space<vmem>>, %arg3: memref<32x32xf32, #tpu.memory_space<vmem>>, %arg4: memref<1x32xf32, #tpu.memory_space<vmem>>, %arg5: memref<32x32xf32, #tpu.memory_space<vmem>>, %arg6: memref<1x32xf32, #tpu.memory_space<vmem>>, %arg7: memref<32x8xf32, #tpu.memory_space<vmem>>, %arg8: memref<32x8xf32, #tpu.memory_space<vmem>>, %arg9: memref<1x8xf32, #tpu.memory_space<vmem>>, %arg10: memref<32x32xf32, #tpu.memory_space<vmem>>, %arg11: memref<1x32xf32, #tpu.memory_space<vmem>>, %arg12: memref<2x8x32xf32, #tpu.memory_space<vmem>>) attributes {dimension_semantics = [#tpu.dimension_semantics<parallel>], iteration_bounds = array<i64: 2>, scalar_prefetch = 0 : i64, scratch_operands = 0 : i64, tpu.core_type = #tpu.core_type<tc>, window_params = [{transform_indices = @transform_0, window_bounds = array<i64: 2, 8, 32>}, {pipeline_mode = #tpu.pipeline_mode<synchronous>, transform_indices = @transform_1, window_bounds = array<i64: 8, 8>}, {pipeline_mode = #tpu.pipeline_mode<synchronous>, transform_indices = @transform_2, window_bounds = array<i64: 32, 32>}, {pipeline_mode = #tpu.pipeline_mode<synchronous>, transform_indices = @transform_3, window_bounds = array<i64: 1, 32>}, {pipeline_mode = #tpu.pipeline_mode<synchronous>, transform_indices = @transform_4, window_bounds = array<i64: 32, 32>}, {pipeline_mode = #tpu.pipeline_mode<synchronous>, transform_indices = @transform_5, window_bounds = array<i64: 1, 32>}, {pipeline_mode = #tpu.pipeline_mode<synchronous>, transform_indices = @transform_6, window_bounds = array<i64: 32, 8>}, {pipeline_mode = #tpu.pipeline_mode<synchronous>, transform_indices = @transform_7, window_bounds = array<i64: 32, 8>}, {pipeline_mode = #tpu.pipeline_mode<synchronous>, transform_indices = @transform_8, window_bounds = array<i64: 1, 8>}, {pipeline_mode = #tpu.pipeline_mode<synchronous>, transform_indices = @transform_9, window_bounds = array<i64: 32, 32>}, {pipeline_mode = #tpu.pipeline_mode<synchronous>, transform_indices = @transform_10, window_bounds = array<i64: 1, 32>}, {transform_indices = @transform_11, window_bounds = array<i64: 2, 8, 32>}]} {
    %c0 = arith.constant 0 : index
    %c0_0 = arith.constant 0 : index
    %c0_1 = arith.constant 0 : index
    %0 = vector.load %arg1[%c0, %c0_0, %c0_1] : memref<2x8x32xf32, #tpu.memory_space<vmem>>, vector<2x8x32xf32>
    %c0_2 = arith.constant 0 : index
    %c0_3 = arith.constant 0 : index
    %1 = vector.load %arg2[%c0_2, %c0_3] : memref<8x8xf32, #tpu.memory_space<vmem>>, vector<8x8xf32>
    %2 = vector.extract_strided_slice %0 {offsets = [0, 0, 0], sizes = [1, 8, 32], strides = [1, 1, 1]} : vector<2x8x32xf32> to vector<1x8x32xf32>
    %3 = vector.shape_cast %2 : vector<1x8x32xf32> to vector<8x32xf32>
    %cst = arith.constant dense<0.000000e+00> : vector<8x32xf32>
    %4 = tpu.matmul %1, %3, %cst {dimension_numbers = #tpu.dot_dimension_numbers<[1], [0], [0], [1], [0, 0, 1, 1], [], []>} : vector<8x8xf32>, vector<8x32xf32>, vector<8x32xf32> -> vector<8x32xf32>
    %5 = vector.extract_strided_slice %0 {offsets = [1, 0, 0], sizes = [1, 8, 32], strides = [1, 1, 1]} : vector<2x8x32xf32> to vector<1x8x32xf32>
    %6 = vector.shape_cast %5 : vector<1x8x32xf32> to vector<8x32xf32>
    %cst_4 = arith.constant dense<0.000000e+00> : vector<8x32xf32>
    %7 = tpu.matmul %1, %6, %cst_4 {dimension_numbers = #tpu.dot_dimension_numbers<[1], [0], [0], [1], [0, 0, 1, 1], [], []>} : vector<8x8xf32>, vector<8x32xf32>, vector<8x32xf32> -> vector<8x32xf32>
    %8 = tpu.concatenate %4, %7 in 0 : vector<8x32xf32>, vector<8x32xf32> -> vector<16x32xf32>
    %cst_5 = arith.constant 2.000000e-01 : f32
    %9 = vector.broadcast %cst_5 : f32 to vector<16x32xf32>
    %10 = arith.mulf %9, %8 : vector<16x32xf32>
    %11 = arith.maximumf %8, %10 : vector<16x32xf32>
    %c0_6 = arith.constant 0 : index
    %c0_7 = arith.constant 0 : index
    %12 = vector.load %arg3[%c0_6, %c0_7] : memref<32x32xf32, #tpu.memory_space<vmem>>, vector<32x32xf32>
    %cst_8 = arith.constant dense<0.000000e+00> : vector<16x32xf32>
    %13 = tpu.matmul %11, %12, %cst_8 {dimension_numbers = #tpu.dot_dimension_numbers<[1], [0], [0], [1], [0, 0, 1, 1], [], []>} : vector<16x32xf32>, vector<32x32xf32>, vector<16x32xf32> -> vector<16x32xf32>
    %c0_9 = arith.constant 0 : index
    %c0_10 = arith.constant 0 : index
    %14 = vector.load %arg4[%c0_9, %c0_10] : memref<1x32xf32, #tpu.memory_space<vmem>>, vector<1x32xf32>
    %15 = vector.broadcast %14 : vector<1x32xf32> to vector<16x32xf32>
    %16 = arith.addf %13, %15 : vector<16x32xf32>
    %cst_11 = arith.constant 2.000000e-01 : f32
    %17 = vector.broadcast %cst_11 : f32 to vector<16x32xf32>
    %18 = arith.mulf %17, %16 : vector<16x32xf32>
    %19 = arith.maximumf %16, %18 : vector<16x32xf32>
    %20 = vector.shape_cast %19 : vector<16x32xf32> to vector<2x8x32xf32>
    %21 = arith.addf %0, %20 : vector<2x8x32xf32>
    %cst_12 = arith.constant dense<0.000000e+00> : vector<2x32xf32>
    %22 = vector.multi_reduction <add>, %21, %cst_12 [1] : vector<2x8x32xf32> to vector<2x32xf32>
    %cst_13 = arith.constant 8.000000e+00 : f32
    %23 = vector.broadcast %cst_13 : f32 to vector<2x32xf32>
    %24 = arith.divf %22, %23 : vector<2x32xf32>
    %c0_14 = arith.constant 0 : index
    %c0_15 = arith.constant 0 : index
    %25 = vector.load %arg5[%c0_14, %c0_15] : memref<32x32xf32, #tpu.memory_space<vmem>>, vector<32x32xf32>
    %cst_16 = arith.constant dense<0.000000e+00> : vector<2x32xf32>
    %26 = tpu.matmul %24, %25, %cst_16 {dimension_numbers = #tpu.dot_dimension_numbers<[1], [0], [0], [1], [0, 0, 1, 1], [], []>} : vector<2x32xf32>, vector<32x32xf32>, vector<2x32xf32> -> vector<2x32xf32>
    %c0_17 = arith.constant 0 : index
    %c0_18 = arith.constant 0 : index
    %27 = vector.load %arg6[%c0_17, %c0_18] : memref<1x32xf32, #tpu.memory_space<vmem>>, vector<1x32xf32>
    %28 = vector.broadcast %27 : vector<1x32xf32> to vector<2x32xf32>
    %29 = arith.addf %26, %28 : vector<2x32xf32>
    %cst_19 = arith.constant 2.000000e-01 : f32
    %30 = vector.broadcast %cst_19 : f32 to vector<2x32xf32>
    %31 = arith.mulf %30, %29 : vector<2x32xf32>
    %32 = arith.maximumf %29, %31 : vector<2x32xf32>
    %33 = vector.shape_cast %21 : vector<2x8x32xf32> to vector<16x32xf32>
    %c0_20 = arith.constant 0 : index
    %c0_21 = arith.constant 0 : index
    %34 = vector.load %arg7[%c0_20, %c0_21] : memref<32x8xf32, #tpu.memory_space<vmem>>, vector<32x8xf32>
    %cst_22 = arith.constant dense<0.000000e+00> : vector<16x8xf32>
    %35 = tpu.matmul %33, %34, %cst_22 {dimension_numbers = #tpu.dot_dimension_numbers<[1], [0], [0], [1], [0, 0, 1, 1], [], []>} : vector<16x32xf32>, vector<32x8xf32>, vector<16x8xf32> -> vector<16x8xf32>
    %36 = vector.shape_cast %35 : vector<16x8xf32> to vector<2x8x8xf32>
    %c0_23 = arith.constant 0 : index
    %c0_24 = arith.constant 0 : index
    %37 = vector.load %arg8[%c0_23, %c0_24] : memref<32x8xf32, #tpu.memory_space<vmem>>, vector<32x8xf32>
    %cst_25 = arith.constant dense<0.000000e+00> : vector<2x8xf32>
    %38 = tpu.matmul %32, %37, %cst_25 {dimension_numbers = #tpu.dot_dimension_numbers<[1], [0], [0], [1], [0, 0, 1, 1], [], []>} : vector<2x32xf32>, vector<32x8xf32>, vector<2x8xf32> -> vector<2x8xf32>
    %39 = vector.shape_cast %38 : vector<2x8xf32> to vector<2x1x8xf32>
    %40 = vector.broadcast %39 : vector<2x1x8xf32> to vector<2x8x8xf32>
    %41 = arith.addf %36, %40 : vector<2x8x8xf32>
    %c0_26 = arith.constant 0 : index
    %c0_27 = arith.constant 0 : index
    %42 = vector.load %arg9[%c0_26, %c0_27] : memref<1x8xf32, #tpu.memory_space<vmem>>, vector<1x8xf32>
    %43 = vector.shape_cast %42 : vector<1x8xf32> to vector<1x1x8xf32>
    %44 = vector.broadcast %43 : vector<1x1x8xf32> to vector<2x8x8xf32>
    %45 = arith.addf %41, %44 : vector<2x8x8xf32>
    %46 = arith.negf %45 : vector<2x8x8xf32>
    %47 = math.exp %46 : vector<2x8x8xf32>
    %cst_28 = arith.constant 1.000000e+00 : f32
    %48 = vector.broadcast %cst_28 : f32 to vector<2x8x8xf32>
    %49 = arith.addf %48, %47 : vector<2x8x8xf32>
    %50 = arith.divf %48, %49 : vector<2x8x8xf32>
    "tpu.trace_start"() <{level = 10 : i32, message = "bqp,bpc->bqc"}> : () -> ()
    %cst_29 = arith.constant dense<0.000000e+00> : vector<2x8x32xf32>
    %51 = tpu.matmul %50, %21, %cst_29 {dimension_numbers = #tpu.dot_dimension_numbers<[2], [1], [1], [2], [0, 0, 0, 1, 1, 2], [0], [0]>} : vector<2x8x8xf32>, vector<2x8x32xf32>, vector<2x8x32xf32> -> vector<2x8x32xf32>
    "tpu.trace_stop"() : () -> ()
    %cst_30 = arith.constant 2.000000e-01 : f32
    %52 = vector.broadcast %cst_30 : f32 to vector<2x8x32xf32>
    %53 = arith.mulf %52, %51 : vector<2x8x32xf32>
    %54 = arith.maximumf %51, %53 : vector<2x8x32xf32>
    %55 = vector.shape_cast %54 : vector<2x8x32xf32> to vector<16x32xf32>
    %c0_31 = arith.constant 0 : index
    %c0_32 = arith.constant 0 : index
    %56 = vector.load %arg10[%c0_31, %c0_32] : memref<32x32xf32, #tpu.memory_space<vmem>>, vector<32x32xf32>
    %cst_33 = arith.constant dense<0.000000e+00> : vector<16x32xf32>
    %57 = tpu.matmul %55, %56, %cst_33 {dimension_numbers = #tpu.dot_dimension_numbers<[1], [0], [0], [1], [0, 0, 1, 1], [], []>} : vector<16x32xf32>, vector<32x32xf32>, vector<16x32xf32> -> vector<16x32xf32>
    %c0_34 = arith.constant 0 : index
    %c0_35 = arith.constant 0 : index
    %58 = vector.load %arg11[%c0_34, %c0_35] : memref<1x32xf32, #tpu.memory_space<vmem>>, vector<1x32xf32>
    %59 = vector.broadcast %58 : vector<1x32xf32> to vector<16x32xf32>
    %60 = arith.addf %57, %59 : vector<16x32xf32>
    %cst_36 = arith.constant 2.000000e-01 : f32
    %61 = vector.broadcast %cst_36 : f32 to vector<16x32xf32>
    %62 = arith.mulf %61, %60 : vector<16x32xf32>
    %63 = arith.maximumf %60, %62 : vector<16x32xf32>
    %64 = vector.shape_cast %63 : vector<16x32xf32> to vector<2x8x32xf32>
    %c0_37 = arith.constant 0 : index
    %c0_38 = arith.constant 0 : index
    %c0_39 = arith.constant 0 : index
    %65 = vector.load %arg12[%c0_37, %c0_38, %c0_39] : memref<2x8x32xf32, #tpu.memory_space<vmem>>, vector<2x8x32xf32>
    tpu.vector_store %arg12[%c0_37, %c0_38, %c0_39], %64 {strides = array<i32>} : memref<2x8x32xf32, #tpu.memory_space<vmem>>, vector<2x8x32xf32>,
    return
  }
  func.func @transform_0(%arg0: i32) -> (i32, i32, i32) {
    %c0_i32 = arith.constant 0 : i32
    %c0_i32_0 = arith.constant 0 : i32
    %c0_i32_1 = arith.constant 0 : i32
    return %arg0, %c0_i32, %c0_i32_0 : i32, i32, i32
  }
  func.func @transform_1(%arg0: i32) -> (i32, i32) {
    %c0_i32 = arith.constant 0 : i32
    %c0_i32_0 = arith.constant 0 : i32
    %c0_i32_1 = arith.constant 0 : i32
    return %c0_i32, %c0_i32_0 : i32, i32
  }
  func.func @transform_2(%arg0: i32) -> (i32, i32) {
    %c0_i32 = arith.constant 0 : i32
    %c0_i32_0 = arith.constant 0 : i32
    %c0_i32_1 = arith.constant 0 : i32
    return %c0_i32, %c0_i32_0 : i32, i32
  }
  func.func @transform_3(%arg0: i32) -> (i32, i32) {
    %c0_i32 = arith.constant 0 : i32
    %c0_i32_0 = arith.constant 0 : i32
    %c0_i32_1 = arith.constant 0 : i32
    return %c0_i32, %c0_i32_0 : i32, i32
  }
  func.func @transform_4(%arg0: i32) -> (i32, i32) {
    %c0_i32 = arith.constant 0 : i32
    %c0_i32_0 = arith.constant 0 : i32
    %c0_i32_1 = arith.constant 0 : i32
    return %c0_i32, %c0_i32_0 : i32, i32
  }
  func.func @transform_5(%arg0: i32) -> (i32, i32) {
    %c0_i32 = arith.constant 0 : i32
    %c0_i32_0 = arith.constant 0 : i32
    %c0_i32_1 = arith.constant 0 : i32
    return %c0_i32, %c0_i32_0 : i32, i32
  }
  func.func @transform_6(%arg0: i32) -> (i32, i32) {
    %c0_i32 = arith.constant 0 : i32
    %c0_i32_0 = arith.constant 0 : i32
    %c0_i32_1 = arith.constant 0 : i32
    return %c0_i32, %c0_i32_0 : i32, i32
  }
  func.func @transform_7(%arg0: i32) -> (i32, i32) {
    %c0_i32 = arith.constant 0 : i32
    %c0_i32_0 = arith.constant 0 : i32
    %c0_i32_1 = arith.constant 0 : i32
    return %c0_i32, %c0_i32_0 : i32, i32
  }
  func.func @transform_8(%arg0: i32) -> (i32, i32) {
    %c0_i32 = arith.constant 0 : i32
    %c0_i32_0 = arith.constant 0 : i32
    %c0_i32_1 = arith.constant 0 : i32
    return %c0_i32, %c0_i32_0 : i32, i32
  }
  func.func @transform_9(%arg0: i32) -> (i32, i32) {
    %c0_i32 = arith.constant 0 : i32
    %c0_i32_0 = arith.constant 0 : i32
    %c0_i32_1 = arith.constant 0 : i32
    return %c0_i32, %c0_i32_0 : i32, i32
  }
  func.func @transform_10(%arg0: i32) -> (i32, i32) {
    %c0_i32 = arith.constant 0 : i32
    %c0_i32_0 = arith.constant 0 : i32
    %c0_i32_1 = arith.constant 0 : i32
    return %c0_i32, %c0_i32_0 : i32, i32
  }
  func.func @transform_11(%arg0: i32) -> (i32, i32, i32) {
    %c0_i32 = arith.constant 0 : i32
    %c0_i32_0 = arith.constant 0 : i32
    %c0_i32_1 = arith.constant 0 : i32
    return %arg0, %c0_i32, %c0_i32_0 : i32, i32, i32
  }
}

</mosaic_0001>

<bundles_post_ra>
// kernel: tpu_custom_call.1
= control target key start
LH: loop header
LB: loop body
LE: loop exit
PB: predicated region body
PF: predicated region fallthrough
CT: control target
= control target key end

     0   :  { %s2215_s0 = inlined_call_operand.vmem [shape: f32[4,8,32], index: 0, kind: input, shape index: {}]   ;;  %s2216_s1 = inlined_call_operand.hbm [shape: f32[8,8], index: 1, kind: input, shape index: {}]   ;;  %s2217_s2 = inlined_call_operand.vmem [shape: f32[32,32], index: 2, kind: input, shape index: {}]   ;;  %s2218_s3 = inlined_call_operand.hbm [shape: f32[1,32], index: 3, kind: input, shape index: {}]   ;;  %s2219_s4 = inlined_call_operand.hbm [shape: f32[32,32], index: 4, kind: input, shape index: {}]   ;;  %s2220_s5 = inlined_call_operand.hbm [shape: f32[1,32], index: 5, kind: input, shape index: {}]   ;;  %s2221_s6 = inlined_call_operand.vmem [shape: f32[32,8], index: 6, kind: input, shape index: {}]   ;;  %s2222_s7 = inlined_call_operand.vmem [shape: f32[32,8], index: 7, kind: input, shape index: {}]   ;;  %s2223_s8 = inlined_call_operand.hbm [shape: f32[1,8], index: 8, kind: input, shape index: {}]   ;;  %s2224_s9 = inlined_call_operand.vmem [shape: f32[32,32], index: 9, kind: input, shape index: {}]   ;;  %s2225_s10 = inlined_call_operand.vmem [shape: f32[1,32], index: 10, kind: input, shape index: {}]   ;;  %s2226_s11 = inlined_call_operand.hbm [shape: f32[4,8,32], index: 11, kind: output, shape index: {}]  }
   0x1   :  { %2231 = sst [smem:[#allocation18_spill]] %s2216_s1 }
   0x2   :  { %2232 = sst [smem:[#allocation19_spill]] %s2218_s3 }
   0x3   :  { %16 = vsyncpa [#allocation3], 0 }
   0x4   :  { %17 = vsyncpa [#allocation6], 0 }
   0x5   :  { %18 = vsyncpa [#allocation9], 0 }
   0x6   :  { %19 = vsyncpa [#allocation4], 0 }
   0x7   :  { %21 = vsyncpa [#allocation4 + $0x1], 0  ;;  %s1935_s17 = smov 0   ;;  %s1937_s18 = smov 0  }
   0x8   :  { %s1939_s19 = smov 0   ;;  %s1941_s20 = smov 0  }
   0x9 LB: > { %2233 = sst [smem:[#allocation16_spill]] %s1856_s19  ;;  %s1956_s21 = sadd.s32 4294967295, %s1860_s20   ;;  %s1860_s20 = sphi %s1941_s20, %s2255_s20   ;;  %s1856_s19 = sphi %s1939_s19, %s2252_s19   ;;  %s1852_s18 = sphi %s1937_s18, %s2254_s18   ;;  %s1848_s17 = sphi %s1935_s17, %s2253_s17  }
   0xa   : > { %s1401_s22 = sadd.s32 4294967294, %s1860_s20   ;;  %s1960_s23 = sadd.s32 1, %s1860_s20  }
   0xb   : > { %s270_s24 = sadd.s32 1, %s1856_s19  ;;  %s267_s25 = ssub.s32 %s1860_s20, %s1960_s23 }
   0xc   : > { %p280_p0 = scmp.ne.s32.totalorder %s1856_s19, %s1852_s18  ;;  %p268_p1 = scmp.eq.s32.totalorder %s267_s25, 0 }
   0xd   : > { %p281_p2 = scmp.eq.s32.totalorder %s1956_s21, 1  ;;  %p286_p3 = scmp.ne.s32.totalorder %s1852_s18, %s1848_s17 }
   0xe   : > { %p287_p4 = scmp.eq.s32.totalorder %s1401_s22, 1  ;;  %p1402_p7 = scmp.ge.s32.totalorder %s1860_s20, 1 }
   0xf   : > { %s1971_s26 = scalar_select %p268_p1, %s1856_s19, %s270_s24  }
  0x10   : > { %p1973_p5 = por %p281_p2, %p280_p0  ;;  %p1977_p6 = por %p287_p4, %p286_p3 }
  0x11   : > { %2234 = sst [smem:[#allocation17_spill]] %s1971_s26  ;;  %p294_p8 = scmp.lt.s32.totalorder %s1860_s20, 3 }
  0x12   : > { %s2235_s27 = scalar_select %p1973_p5, 1, 0 }
  0x13   : > { %s2236_s28 = scalar_select %p1977_p6, 1, 0 }
  0x14   : > { %p2227_p9 = scmp.eq.s32.totalorder %s1956_s21, 0  ;;  %p1984_p10 = pnand %p1402_p7, %p294_p8 }
  0x15   : > { %s1862_s30 = smov [#allocation5]   ;;  %s1863_s13 = smov [#allocation8]  }
  0x16   : > { %s2237_s29 = scalar_select %p1984_p10, 1, 0 }
  0x17   : > { %s321_s12 = sshll.u32 %s1862_s30, 4  ;;  %p1575_p11 = pneg %p1984_p10  ;;  %s322_s12 = int_to_ptr.vmem [resolvable:$true] %s321_s12 }
  0x18   : > { %s345_s14 = sshll.u32 %s1863_s13, 4  ;;  %s1864_s16 = smov [#allocation2]   ;;  %s346_s14 = int_to_ptr.vmem [resolvable:$true] %s345_s14 }
  0x19   : > { %p1992_p12 = pnand %p2227_p9, %p1575_p11  ;;  %s307_s22 = sshll.u32 %s1864_s16, 4  ;;  %s1996_s22 = int_to_ptr.vmem [resolvable:$true] %s307_s22 }
  0x1a   : > { %s1669_s25 = scalar_lea.vmem %s322_s12, 16  ;;  %s1676_s30 = scalar_lea.vmem %s322_s12, 32 }
  0x1b   : > { %p2000_p13 = pneg %p1992_p12  ;;  %p1670_p0 = scmp.ne.s32.totalorder %s322_s12, %s1669_s25 }
  0x1c   : > { %p1677_p3 = scmp.lt.s32.totalorder %s322_s12, %s322_s12  ;;  %p1678_p4 = scmp.lt.s32.totalorder %s1676_s30, %s1669_s25 }
  0x1d   : > { %p1672_p1 = pnand %p1670_p0, %p2000_p13 }
  0x1e   : > { %p1679_p7 = por %p1678_p4, %p1677_p3 }
  0x1f   : > { %p1673_p2 = pneg %p1672_p1 }
  0x21   : > { %p1680_p8 = pnand %p1679_p7, %p1673_p2 }
  0x23   : > { %1683 = shalt.err (!%p1680_p8)
}
  0x24   : > { %s2240_s3 = sld [smem:[#allocation19_spill]]  ;;  %s1695_s26 = scalar_lea.vmem %s346_s14, 16 }
  0x25   : > { %p1696_p11 = scmp.ne.s32.totalorder %s346_s14, %s1695_s26  ;;  %s1702_s19 = scalar_lea.vmem %s346_s14, 32 }
  0x26   : > { %p1703_p0 = scmp.lt.s32.totalorder %s346_s14, %s346_s14  ;;  %p1704_p1 = scmp.lt.s32.totalorder %s1702_s19, %s1695_s26 }
  0x27   : > { %p1698_p9 = pnand %p1696_p11, %p2000_p13 }
  0x28   : > { %p1705_p5 = por %p1704_p1, %p1703_p0 }
  0x29   : > { %p1699_p6 = pneg %p1698_p9 }
  0x2a   : > { %1581 = dma.hbm_to_vmem [thread:$0]  (!%p1992_p12), %s2240_s3, 16, %s322_s12, [#allocation6]  }
  0x2b   : > { %p1706_p10 = pnand %p1705_p5, %p1699_p6 }
  0x2d   : > { %1709 = shalt.err (!%p1706_p10)
}
  0x2e   : > { %1587 = dma.hbm_to_vmem [thread:$0]  (!%p1992_p12), %s2220_s5, 16, %s346_s14, [#allocation9]  }
  0x2f   : > { %s1721_s12 = scalar_lea.vmem %s1996_s22, 128  ;;  %p1729_p4 = scmp.lt.s32.totalorder %s1996_s22, %s1996_s22 }
  0x30   : > { %p1722_p2 = scmp.ne.s32.totalorder %s1996_s22, %s1721_s12  ;;  %p1730_p7 = scmp.lt.s32.totalorder %s1721_s12, %s1721_s12 }
  0x32   : > { %p1724_p9 = pnand %p1722_p2, %p2000_p13  ;;  %p1731_p5 = por %p1730_p7, %p1729_p4 }
  0x34   : > { %p1725_p3 = pneg %p1724_p9 }
  0x36   : > { %p1732_p6 = pnand %p1731_p5, %p1725_p3 }
  0x38   : > { %1735 = shalt.err (!%p1732_p6)
}
  0x39   : > { %s2241_s1 = sld [smem:[#allocation18_spill]]  ;;  %s1865_s14 = smov [#allocation7]  }
  0x3a   : > { %s331_s13 = sshll.u32 %s1865_s14, 4  ;;  %s332_s13 = int_to_ptr.vmem [resolvable:$true] %s331_s13 }
  0x3b   : > { %s1747_s16 = scalar_lea.vmem %s332_s13, 512  ;;  %p1755_p0 = scmp.lt.s32.totalorder %s332_s13, %s332_s13 }
  0x3c   : > { %p1748_p10 = scmp.ne.s32.totalorder %s332_s13, %s1747_s16  ;;  %p1756_p1 = scmp.lt.s32.totalorder %s1747_s16, %s1747_s16 }
  0x3e   : > { %p1750_p8 = pnand %p1748_p10, %p2000_p13  ;;  %p1757_p2 = por %p1756_p1, %p1755_p0 }
  0x3f   : > { %1578 = dma.hbm_to_vmem [thread:$0]  (!%p1992_p12), %s2241_s1, 128, %s1996_s22, [#allocation3]  }
  0x40   : > { %p1751_p11 = pneg %p1750_p8 }
  0x42   : > { %p1758_p9 = pnand %p1757_p2, %p1751_p11 }
  0x44   : > { %1761 = shalt.err (!%p1758_p9)
}
  0x45   : > { %s1866_s25 = smov 128   ;;  %s1867_s30 = smov 8  }
  0x46   : > { %1584 = dma.hbm_to_vmem [thread:$0]  (!%p1992_p12), %s2219_s4, 512, %s332_s13, [#allocation6], %s1866_s25, %s1866_s25, %s1867_s30  }
  0x47   : > { %s1868_s19 = smov [#allocation10]  }
  0x48   : > { %s362_s26 = sshll.u32 %s1868_s19, 4  ;;  %s363_s26 = int_to_ptr.vmem [resolvable:$true] %s362_s26 }
  0x49   : > { %s1773_s14 = scalar_lea.vmem %s363_s26, 16  ;;  %s1780_s16 = scalar_lea.vmem %s363_s26, 32 }
  0x4a   : > { %p1774_p3 = scmp.ne.s32.totalorder %s363_s26, %s1773_s14  ;;  %p1781_p5 = scmp.lt.s32.totalorder %s363_s26, %s363_s26 }
  0x4b   : > { %p1782_p6 = scmp.lt.s32.totalorder %s1780_s16, %s1773_s14 }
  0x4c   : > { %p1776_p4 = pnand %p1774_p3, %p2000_p13 }
  0x4d   : > { %p1783_p10 = por %p1782_p6, %p1781_p5 }
  0x4e   : > { %p1777_p7 = pneg %p1776_p4 }
  0x50   : > { %p1784_p8 = pnand %p1783_p10, %p1777_p7 }
  0x52   : > { %1787 = shalt.err (!%p1784_p8)
}
  0x53   : > { %1590 = dma.hbm_to_vmem [thread:$0]  (!%p1992_p12), %s2223_s8, 16, %s363_s26, [#allocation9]  }
  0x54   : > { %p2242_p11 = scmp.ne.s32.totalorder %s2237_s29, 0 }
  0x55   : > { %p2243_p0 = scmp.eq.s32.totalorder (!%p2242_p11), %s1956_s21, 0 }
  0x56   : > { %390 = sbr.rel (%p2242_p11) target bundleno = 1373 (0x55d), region = 64 }
  0x5b   : > { %1831 = dma.done.wait (%p2243_p0), [#allocation3], 128   ;;  %p2244_p13 = pmov %p2243_p0 }
  0x5c   : > { %p2245_p1 = pmov %p2243_p0 }
  0x5d   : > { %1833 = vsyncadd (%p2244_p13), [#allocation3], 4294967168 }
  0x5e   : > { %1835 = dma.done.wait (%p2245_p1), [#allocation6], 528   ;;  %p2246_p2 = pmov %p2243_p0 }
  0x5f   : > { %p2247_p9 = pmov %p2243_p0 }
  0x60   : > { %1837 = vsyncadd (%p2246_p2), [#allocation6], 4294966768 }
  0x61   : > { %1839 = dma.done.wait (%p2247_p9), [#allocation9], 32   ;;  %p2248_p12 = pmov %p2243_p0 }
  0x62   : > { %s1416_s1 = sshll.u32 %s1956_s21, 1  ;;  %v1869_v0 = vmov 0.0   ;;  %vm1870_vm0 = vmmov 0   ;;  %vm456_vm1 = vcmask 64512   ;;  %v455_v3 = vld [vmem:[#allocation2] sm:$0xff]  ;;  %v607_v4 = vld [vmem:[%s2217_s2 + $0x18] sm:$0xff] }
  0x63   : > { %1841 = vsyncadd (%p2248_p12), [#allocation9], 4294967264  ;;  %1478 = vmatprep.subr.mxu0 %v1869_v0  ;;  %1483 = vmatprep.subr.mxu1 %v1869_v0  ;;  %p447_p3 = scmp.lt.s32.totalorder %s1416_s1, 3  ;;  %v606_v5 = vld [vmem:[%s2217_s2 + $0x10] sm:$0xff]  ;;  %v605_v6 = vld [vmem:[%s2217_s2 + $0x8] sm:$0xff]  ;;  %vm615_vm2 = vcmask 261120  }
  0x64   : > { %1480 = vmatprep.mubr.msk.f32.mxu0 %vm1870_vm0, %v1869_v0  ;;  %1485 = vmatprep.mubr.msk.f32.mxu1 %vm1870_vm0, %v1869_v0  ;;  %v604_v7 = vld [vmem:[%s2217_s2] sm:$0xff]  ;;  %v812_v16 = vld [vmem:[%s2221_s6 + $0x18] sm:$0xff]  ;;  %v811_v17 = vld [vmem:[%s2221_s6 + $0x10] sm:$0xff]  ;;  %vm733_vm3 = vcmask 1041409   ;;  %v1871_v62 = vmov 1966171168  }
  0x65   : > { %s2257_s1 = smov (!%p447_p3, %s1416_s1), 3  ;;  %v810_v18 = vld [vmem:[%s2221_s6 + $0x8] sm:$0xff]  ;;  %v809_v19 = vld [vmem:[%s2221_s6] sm:$0xff]  ;;  %v721_v22 = vld [vmem:[#allocation7 + $0x8] sm:$0xff]  ;;  %v973_v63 = vunpack.c.l.s4 %v1871_v62  ;;  %s443_s22 = sand.u32 1, %s1852_s18  }
  0x66   : > { %s1417_s3 = sshll.u32 %s2257_s1, 3  ;;  %v723_v20 = vld [vmem:[#allocation7 + $0x18] sm:$0xff]  ;;  %v722_v21 = vld [vmem:[#allocation7 + $0x10] sm:$0xff]  ;;  %v720_v23 = vld [vmem:[#allocation7] sm:$0xff]  ;;  %s1415_s19 = sshll.u32 %s443_s22, 4 }
  0x67   : > { %s450_s24 = scalar_lea.vmem %s2215_s0, %s1417_s3  ;;  %v1420_v24 = vld [vmem:[#allocation5] ss:$0 sm:$0xff]  ;;  %v897_v52 = vld [vmem:[%s2222_s7 + $0x18] sm:$0xff]  ;;  %v896_v53 = vld [vmem:[%s2222_s7 + $0x10] sm:$0xff]  ;;  %s1441_s16 = sshll.u32 %s1956_s21, 8 }
  0x68   : > { %v2068_v1 = vld [vmem:[%s450_s24] sm:$0xff]  ;;  %v2070_v2 = vld [vmem:[%s450_s24 + $0x8] sm:$0xff]  ;;  %s445_s1 = scalar_lea.vmem [#allocation11], %s1415_s19  ;;  %s2169_s24 = scalar_lea.hbm %s2226_s11, %s1441_s16 }
  0x69   : > { %1479 = vmatpush3.msra.mxu0 %v2068_v1  ;;  %1484 = vmatpush3.msra.mxu1 %v2070_v2  ;;  %v895_v54 = vld [vmem:[%s2222_s7 + $0x8] sm:$0xff]  ;;  %v894_v55 = vld [vmem:[%s2222_s7] sm:$0xff]  ;;  %s1289_s3 = sshll.u32 %s445_s1, 4  ;;  %s2175_s21 = scalar_lea.sflag [#allocation4], %s443_s22  ;;  %s2171_s3 = int_to_ptr.vmem [resolvable:$true] %s1289_s3 }
  0x6a   : > { %1481 = vmatmul.mubr.msk.f32.vlgmr.msra.gmra.mxu0 %vm456_vm1, %v455_v3  ;;  %1486 = vmatmul.mubr.msk.f32.vlgmr.msra.gmra.mxu1 %vm456_vm1, %v455_v3  ;;  %v1423_v56 = vld [vmem:[#allocation8] ss:$0 sm:$0xff]  ;;  %s1788_s13 = scalar_lea.vmem %s2171_s3, 256  ;;  %p2249_p7 = scmp.ne.s32.totalorder %s2235_s27, 0 }
  0x6b   : > { %1488 = vmatprep.subr.mxu0 %v607_v4  ;;  %1499 = vmatprep.subr.mxu1 %v1869_v0  ;;  %p1789_p4 = scmp.ne.s32.totalorder %s2171_s3, %s1788_s13  ;;  %s1872_s25 = smov [#allocation11]  }
  0x6c   : > { %1489 = vmatpush3.msra.mxu0 %v607_v4  ;;  %1507 = vmatprep.mubr.msk.f32.mxu1 %vm1870_vm0, %v1869_v0  ;;  %s1792_s30 = sshll.u32 %s1872_s25, 4  ;;  %s1793_s30 = int_to_ptr.vmem [resolvable:$false] %s1792_s30 }
  0x6d   : > { %1490 = vmatprep.subr.mxu0 %v606_v5  ;;  %1500 = vmatpush3.msra.mxu1 %v723_v20  ;;  %p1790_p5 = pnand %p1789_p4, %p2249_p7  ;;  %s1794_s12 = scalar_lea.vmem %s1793_s30, 512 }
  0x6e   : > { %1491 = vmatpush3.msra.mxu0 %v606_v5  ;;  %1501 = vmatprep.subr.mxu1 %v1869_v0  ;;  %p1795_p10 = scmp.lt.s32.totalorder %s2171_s3, %s1793_s30  ;;  %p1796_p8 = scmp.lt.s32.totalorder %s1794_s12, %s1788_s13 }
  0x6f   : > { %1492 = vmatprep.subr.mxu0 %v605_v6  ;;  %1502 = vmatpush3.msra.mxu1 %v722_v21  ;;  %p1791_p6 = pneg %p1790_p5 }
  0x70   : > { %1493 = vmatpush3.msra.mxu0 %v605_v6  ;;  %1503 = vmatprep.subr.mxu1 %v1869_v0  ;;  %p1797_p11 = por %p1796_p8, %p1795_p10 }
  0x71   : > { %1494 = vmatprep.subr.mxu0 %v604_v7  ;;  %1504 = vmatpush3.msra.mxu1 %v721_v22 }
  0x72   : > { %1495 = vmatpush3.msra.mxu0 %v604_v7  ;;  %1505 = vmatprep.subr.mxu1 %v1869_v0  ;;  %p1798_p0 = pnand %p1797_p11, %p1791_p6 }
  0x73   : > { %1510 = vmatprep.subr.mxu0 %v812_v16  ;;  %1506 = vmatpush3.msra.mxu1 %v720_v23 }
  0x74   : > { %1521 = vmatprep.subr.mxu1 %v1869_v0 }
 0x12a   : > { %v526_v8 = vpop.f32.mrf.mxu0  ;;  %v596_v9 = vpop.f32.mrf.mxu1 }
 0x12b   : > { %v600_v10 = vmul.f32 0.2, %v526_v8  ;;  %v601_v11 = vmul.f32 0.2, %v596_v9 }
 0x12c   : > { %v1482_v12 = vpop.f32.mrf.mxu0  ;;  %v1487_v13 = vpop.f32.mrf.mxu1 }
 0x12d   : > { %v602_v14 = vmax.f32 %v526_v8, %v600_v10  ;;  %v603_v15 = vmax.f32 %v596_v9, %v601_v11 }
 0x12f   : > { %1496 = vmatprep.mubr.msk.f32.mxu0 %vm615_vm2, %v602_v14 }
 0x130   : > { %1497 = vmatmul.mubr.msk.f32.vlgmr.msra.gmra.mxu0 %vm615_vm2, %v603_v15  ;;  %v1428_v15 = vld [vmem:[#allocation10] ss:$0 sm:$0xff] }
 0x131   : > { %1511 = vmatpush3.msra.mxu0 %v812_v16 }
 0x132   : > { %1512 = vmatprep.subr.mxu0 %v811_v17 }
 0x133   : > { %1513 = vmatpush3.msra.mxu0 %v811_v17 }
 0x134   : > { %1514 = vmatprep.subr.mxu0 %v810_v18 }
 0x135   : > { %1515 = vmatpush3.msra.mxu0 %v810_v18 }
 0x136   : > { %1516 = vmatprep.subr.mxu0 %v809_v19 }
 0x137   : > { %1517 = vmatpush3.msra.mxu0 %v809_v19 }
 0x1f0   : > { %v1498_v25 = vpop.f32.mrf.mxu0 }
 0x1f1   : > { %v694_v26 = vadd.f32 %v1498_v25, %v1420_v24 }
 0x1f2   : > { %v688_v27 = vpop.f32.mrf.mxu0 }
 0x1f3   : > { %v698_v28 = vmul.f32 0.2, %v694_v26  ;;  %v689_v29 = vadd.f32 %v1420_v24, %v688_v27 }
 0x1f5   : > { %v700_v30 = vmax.f32 %v694_v26, %v698_v28  ;;  %v697_v31 = vmul.f32 0.2, %v689_v29 }
 0x1f7   : > { %v2110_v32 = vadd.f32 %v700_v30, %v2070_v2  ;;  %v699_v33 = vmax.f32 %v689_v29, %v697_v31  ;;  %v974_v2 = vunpack.c.0.s8 %v973_v63  ;;  %v1180_v29 = vld [vmem:[%s2224_s9 + $0x18] sm:$0xff]  ;;  %v1179_v30 = vld [vmem:[%s2224_s9 + $0x10] sm:$0xff]  ;;  %v1178_v31 = vld [vmem:[%s2224_s9 + $0x8] sm:$0xff] }
 0x1f8   : > { %1542 = vmatprep.subr.mxu0 %v1180_v29 }
 0x1f9   : > { %v710_v34 = vsel %vm615_vm2, %v2110_v32, 0.0  ;;  %v701_v35 = vadd.f32 %v699_v33, %v2068_v1  ;;  %v975_v1 = vlaneseq }
 0x1fa   : > { %v711_v36 = vrot.slane %v710_v34, 4 }
 0x1fb   : > { %v703_v37 = vsel %vm615_vm2, %v701_v35, 0.0  ;;  %1518 = vmatprep.mubr.msk.f32.mxu0 %vm615_vm2, %v701_v35  ;;  %v976_v3 = vshrl.u32 %v975_v1, 7 }
 0x1fc   : > { %v712_v38 = vadd.f32 %v711_v36, %v710_v34  ;;  %v704_v39 = vrot.slane %v703_v37, 4  ;;  %1519 = vmatmul.mubr.msk.f32.vlgmr.msra.gmra.mxu0 %vm615_vm2, %v2110_v32 }
 0x1fd   : > { %v977_v4 = vsub.s32 %v974_v2, %v976_v3  ;;  %v996_v7 = vsub.s32 0, %v976_v3  ;;  %1543 = vmatpush3.msra.mxu0 %v1180_v29 }
 0x1fe   : > { %v713_v40 = vrot.slane %v712_v38, 2  ;;  %v705_v41 = vadd.f32 %v704_v39, %v703_v37  ;;  %1544 = vmatprep.subr.mxu0 %v1179_v30 }
 0x1ff   : > { %1545 = vmatpush3.msra.mxu0 %v1179_v30 }
 0x200   : > { %v714_v42 = vadd.f32 %v713_v40, %v712_v38  ;;  %v706_v43 = vrot.slane %v705_v41, 2  ;;  %1546 = vmatprep.subr.mxu0 %v1178_v31  ;;  %v1433_v40 = vld [vmem:[%s2225_s10] ss:$0 sm:$0xff] }
 0x201   : > { %1547 = vmatpush3.msra.mxu0 %v1178_v31 }
 0x202   : > { %v707_v44 = vadd.f32 %v706_v43, %v705_v41  ;;  %v715_v45 = vrot.slane %v714_v42, 1 }
 0x204   : > { %v708_v46 = vrot.slane %v707_v44, 1  ;;  %v716_v47 = vadd.f32 %v715_v45, %v714_v42 }
 0x206   : > { %v709_v48 = vadd.f32 %v708_v46, %v707_v44  ;;  %v719_v50 = vmul.f32 0.125, %v716_v47 }
 0x208   : > { %v718_v49 = vmul.f32 0.125, %v709_v48 }
 0x20a   : > { %v734_v51 = vsel %vm733_vm3, %v719_v50, %v718_v49 }
 0x20b   : > { %1508 = vmatmul.mubr.msk.f32.vlgmr.msra.gmra.mxu1 %vm615_vm2, %v734_v51 }
 0x20c   : > { %1529 = vmatprep.mubr.msk.f32.mxu1 %vm1870_vm0, %v1869_v0  ;;  %1522 = vmatpush3.msra.mxu1 %v897_v52 }
 0x20d   : > { %1523 = vmatprep.subr.mxu1 %v1869_v0 }
 0x20e   : > { %1524 = vmatpush3.msra.mxu1 %v896_v53 }
 0x20f   : > { %1525 = vmatprep.subr.mxu1 %v1869_v0 }
 0x210   : > { %1526 = vmatpush3.msra.mxu1 %v895_v54 }
 0x211   : > { %1527 = vmatprep.subr.mxu1 %v1869_v0 }
 0x212   : > { %1528 = vmatpush3.msra.mxu1 %v894_v55 }
 0x213   : > { %1532 = vmatprep.subr.mxu1 %v1869_v0 }
 0x2bc   : > { %v1520_v8 = vpop.f32.mrf.mxu0 }
 0x2be   : > { %v885_v14 = vpop.f32.mrf.mxu0 }
 0x2cb   : > { %v803_v57 = vpop.f32.mrf.mxu1 }
 0x2cc   : > { %v804_v58 = vadd.f32 %v1423_v56, %v803_v57 }
 0x2cd   : > { %v1509_v59 = vpop.f32.mrf.mxu1 }
 0x2ce   : > { %v807_v60 = vmul.f32 0.2, %v804_v58 }
 0x2d0   : > { %v808_v61 = vmax.f32 %v804_v58, %v807_v60 }
 0x2d2   : > { %1530 = vmatmul.mubr.msk.f32.vlgmr.msra.gmra.mxu1 %vm615_vm2, %v808_v61 }
 0x2d3   : > { %1533 = vmatpush3.msra.mxu1 %v701_v35  ;;  %1534 = vmatprep.mubr.msk.f32.mxu1 %vm1870_vm0, %v1869_v0 }
 0x2d4   : > { %1537 = vmatprep.subr.mxu1 %v1869_v0 }
 0x392   : > { %v967_v5 = vpop.f32.mrf.mxu1 }
 0x393   : > { %v978_v6 = vrot.slane %v967_v5, %v977_v4 }
 0x394   : > { %v1531_v9 = vpop.f32.mrf.mxu1 }
 0x395   : > { %v979_v10 = vcombine.high %v978_v6, %v978_v6  ;;  %v986_v11 = vrot.slane %v978_v6, %v977_v4 }
 0x397   : > { %v993_v12 = vrot.slane %v979_v10, %v977_v4  ;;  %v997_v13 = vrot.slane %v986_v11, %v996_v7 }
 0x399   : > { %v1001_v16 = vrot.slane %v993_v12, %v996_v7  ;;  %v1004_v17 = vadd.f32 %v997_v13, %v885_v14 }
 0x39b   : > { %v1005_v18 = vadd.f32 %v1520_v8, %v1001_v16  ;;  %v1013_v19 = vadd.f32 %v1428_v15, %v1004_v17 }
 0x39d   : > { %v1014_v20 = vadd.f32 %v1428_v15, %v1005_v18  ;;  %v1429_v21 = vmul.f32 -1.442695, %v1013_v19 }
 0x39f   : > { %1650 = vpow2.f32 %v1429_v21  ;;  %v1430_v22 = vmul.f32 -1.442695, %v1014_v20 }
 0x3a1   : > { %1652 = vpow2.f32 %v1430_v22 }
 0x3ac   : > { %v1651_v23 = vpop.eup %1650 }
 0x3ad   : > { %v1021_v24 = vadd.f32 1.0, %v1651_v23 }
 0x3ae   : > { %v1653_v25 = vpop.eup %1652 }
 0x3af   : > { %v1022_v26 = vadd.f32 1.0, %v1653_v25  ;;  %1654 = vrcp.f32 %v1021_v24 }
 0x3b1   : > { %1656 = vrcp.f32 %v1022_v26 }
 0x3bc   : > { %v1655_v27 = vpop.eup %1654 }
 0x3bd   : > { %1535 = vmatmul.mubr.msk.f32.vlgmr.msra.gmra.mxu1 %vm456_vm1, %v1655_v27 }
 0x3be   : > { %1538 = vmatpush3.msra.mxu1 %v2110_v32  ;;  %1539 = vmatprep.mubr.msk.f32.mxu1 %vm1870_vm0, %v1869_v0  ;;  %v1657_v28 = vpop.eup %1656  ;;  %v1177_v0 = vld [vmem:[%s2224_s9] sm:$0xff] }
 0x3bf   : > { %1548 = vmatprep.subr.mxu0 %v1177_v0 }
 0x3c0   : > { %1549 = vmatpush3.msra.mxu0 %v1177_v0 }
 0x3c1   : > { %1540 = vmatmul.mubr.msk.f32.vlgmr.msra.gmra.mxu1 %vm456_vm1, %v1657_v28 }
 0x47d   : > { %v1096_v32 = vpop.f32.mrf.mxu1 }
 0x47e   : > { %v1173_v33 = vmul.f32 0.2, %v1096_v32 }
 0x47f   : > { %v1536_v34 = vpop.f32.mrf.mxu1 }
 0x480   : > { %v1175_v35 = vmax.f32 %v1096_v32, %v1173_v33 }
 0x481   : > { %v1169_v36 = vpop.f32.mrf.mxu1 }
 0x482   : > { %v1174_v37 = vmul.f32 0.2, %v1169_v36  ;;  %1550 = vmatprep.mubr.msk.f32.mxu0 %vm615_vm2, %v1175_v35 }
 0x483   : > { %v1541_v38 = vpop.f32.mrf.mxu1 }
 0x484   : > { %v1176_v39 = vmax.f32 %v1169_v36, %v1174_v37 }
 0x486   : > { %1551 = vmatmul.mubr.msk.f32.vlgmr.msra.gmra.mxu0 %vm615_vm2, %v1176_v39 }
 0x546   : > { %v1552_v41 = vpop.f32.mrf.mxu0 }
 0x547   : > { %v1266_v42 = vadd.f32 %v1552_v41, %v1433_v40 }
 0x548   : > { %v1260_v43 = vpop.f32.mrf.mxu0 }
 0x549   : > { %v1270_v44 = vmul.f32 0.2, %v1266_v42  ;;  %v1261_v45 = vadd.f32 %v1433_v40, %v1260_v43 }
 0x54b   : > { %v1272_v46 = vmax.f32 %v1266_v42, %v1270_v44  ;;  %v1269_v47 = vmul.f32 0.2, %v1261_v45 }
 0x54d   : > { %1274 = vst.msk [vmem:[%s445_s1 + $0x8] sm:$0xff] %vm615_vm2, %v1272_v46  ;;  %v1271_v48 = vmax.f32 %v1261_v45, %v1269_v47 }
 0x54f   : > { %1273 = vst.msk [vmem:[%s445_s1] sm:$0xff] %vm615_vm2, %v1271_v48 }
 0x550   : > { %1801 = shalt.err (!%p1798_p0)
}
 0x551   : > { %s1802_s22 = scalar_lea.hbm %s2169_s24, 256  ;;  %s1806_s14 = scalar_lea.hbm %s2226_s11, 512 }
 0x552   : > { %p1803_p13 = scmp.ne.s32.totalorder %s2169_s24, %s1802_s22  ;;  %p1807_p9 = scmp.lt.s32.totalorder %s2169_s24, %s2226_s11 }
 0x553   : > { %p1808_p12 = scmp.lt.s32.totalorder %s1806_s14, %s1802_s22 }
 0x554   : > { %p1804_p1 = pnand %p1803_p13, %p2249_p7 }
 0x555   : > { %p1809_p3 = por %p1808_p12, %p1807_p9 }
 0x556   : > { %p1805_p2 = pneg %p1804_p1 }
 0x558   : > { %p1810_p4 = pnand %p1809_p3, %p1805_p2 }
 0x55a   : > { %1813 = shalt.err (!%p1810_p4)
}
 0x55b   : > { %s1873_s29 = smov 128   ;;  %s1874_s15 = smov 8  }
 0x55c   : > { %1573 = dma.vmem_to_hbm [thread:$0]  (%p2249_p7), %s2171_s3, 256, %s2169_s24, %s2175_s21, %s1873_s29, %s1873_s29, %s1874_s15  }
 0x55d PF: > { %p1605_p5 = scmp.ge.s32.totalorder %s1860_s20, 2  ;;  %s1304_s13 = sand.u32 1, %s1848_s17  }
 0x55e   : > { %p2250_p6 = scmp.ne.s32.totalorder %s2236_s28, 0  ;;  %s1305_s25 = scalar_lea.sflag [#allocation4], %s1304_s13 }
 0x560   : > { %p1592_p10 = pnand %p1605_p5, %p2250_p6 }
 0x562   : > { %p1593_p8 = pneg %p1592_p10 }
 0x564   : > { %1843 = dma.done.wait (%p1593_p8), %s1305_s25, 256  }
 0x565   : > { %1845 = vsyncadd (%p1593_p8), %s1305_s25, 4294967040  ;;  %s2251_s30 = sld [smem:[#allocation16_spill]]  ;;  %p24_p11 = scmp.ge.s32.totalorder %s1960_s23, 4  }
 0x566   : > { %s2252_s19 = sld [smem:[#allocation17_spill]]  ;;  %s2253_s17 = smov %s1852_s18 }
 0x567   : > { %s2255_s20 = smov %s1960_s23  ;;  %26 = sbr.rel (!%p24_p11) target bundleno = 9 (0x9), region = 120 }
 0x56b   : > { %s2254_s18 = smov %s2251_s30 }
 0x56c   :  { %1310 = vsyncpa [#allocation3], 1 }
 0x56d   :  { %1312 = vsyncpa [#allocation3 + $0x1], 1 }
 0x56e   :  { %1313 = vsyncpa [#allocation6], 1 }
 0x56f   :  { %1314 = vsyncpa [#allocation9], 1 }
 0x570   :  { %1315 = vsyncpa [#allocation4], 1 }
 0x571   :  { %1317 = vsyncpa [#allocation4 + $0x1], 1 }

// kernel: tpu_custom_call.1
= control target key start
LH: loop header
LB: loop body
LE: loop exit
PB: predicated region body
PF: predicated region fallthrough
CT: control target
= control target key end

     0   :  { %s2215_s0 = inlined_call_operand.vmem [shape: f32[4,8,32], index: 0, kind: input, shape index: {}]   ;;  %s2216_s1 = inlined_call_operand.hbm [shape: f32[8,8], index: 1, kind: input, shape index: {}]   ;;  %s2217_s2 = inlined_call_operand.vmem [shape: f32[32,32], index: 2, kind: input, shape index: {}]   ;;  %s2218_s3 = inlined_call_operand.hbm [shape: f32[1,32], index: 3, kind: input, shape index: {}]   ;;  %s2219_s4 = inlined_call_operand.hbm [shape: f32[32,32], index: 4, kind: input, shape index: {}]   ;;  %s2220_s5 = inlined_call_operand.hbm [shape: f32[1,32], index: 5, kind: input, shape index: {}]   ;;  %s2221_s6 = inlined_call_operand.vmem [shape: f32[32,8], index: 6, kind: input, shape index: {}]   ;;  %s2222_s7 = inlined_call_operand.vmem [shape: f32[32,8], index: 7, kind: input, shape index: {}]   ;;  %s2223_s8 = inlined_call_operand.hbm [shape: f32[1,8], index: 8, kind: input, shape index: {}]   ;;  %s2224_s9 = inlined_call_operand.vmem [shape: f32[32,32], index: 9, kind: input, shape index: {}]   ;;  %s2225_s10 = inlined_call_operand.vmem [shape: f32[1,32], index: 10, kind: input, shape index: {}]   ;;  %s2226_s11 = inlined_call_operand.hbm [shape: f32[4,8,32], index: 11, kind: output, shape index: {}]  }
   0x1   :  { %2231 = sst [smem:[#allocation18_spill]] %s2216_s1 }
   0x2   :  { %2232 = sst [smem:[#allocation19_spill]] %s2218_s3 }
   0x3   :  { %16 = vsyncpa [#allocation3], 0 }
   0x4   :  { %17 = vsyncpa [#allocation6], 0 }
   0x5   :  { %18 = vsyncpa [#allocation9], 0 }
   0x6   :  { %19 = vsyncpa [#allocation4], 0 }
   0x7   :  { %21 = vsyncpa [#allocation4 + $0x1], 0  ;;  %s1935_s17 = smov 0   ;;  %s1937_s18 = smov 0  }
   0x8   :  { %s1939_s19 = smov 0   ;;  %s1941_s20 = smov 0  }
   0x9 LB: > { %2233 = sst [smem:[#allocation16_spill]] %s1856_s19  ;;  %s1956_s21 = sadd.s32 4294967295, %s1860_s20   ;;  %s1860_s20 = sphi %s1941_s20, %s2255_s20   ;;  %s1856_s19 = sphi %s1939_s19, %s2252_s19   ;;  %s1852_s18 = sphi %s1937_s18, %s2254_s18   ;;  %s1848_s17 = sphi %s1935_s17, %s2253_s17  }
   0xa   : > { %s1401_s22 = sadd.s32 4294967294, %s1860_s20   ;;  %s1960_s23 = sadd.s32 1, %s1860_s20  }
   0xb   : > { %s270_s24 = sadd.s32 1, %s1856_s19  ;;  %s267_s25 = ssub.s32 %s1860_s20, %s1960_s23 }
   0xc   : > { %p280_p0 = scmp.ne.s32.totalorder %s1856_s19, %s1852_s18  ;;  %p268_p1 = scmp.eq.s32.totalorder %s267_s25, 0 }
   0xd   : > { %p281_p2 = scmp.eq.s32.totalorder %s1956_s21, 1  ;;  %p286_p3 = scmp.ne.s32.totalorder %s1852_s18, %s1848_s17 }
   0xe   : > { %p287_p4 = scmp.eq.s32.totalorder %s1401_s22, 1  ;;  %p1402_p7 = scmp.ge.s32.totalorder %s1860_s20, 1 }
   0xf   : > { %s1971_s26 = scalar_select %p268_p1, %s1856_s19, %s270_s24  }
  0x10   : > { %p1973_p5 = por %p281_p2, %p280_p0  ;;  %p1977_p6 = por %p287_p4, %p286_p3 }
  0x11   : > { %2234 = sst [smem:[#allocation17_spill]] %s1971_s26  ;;  %p294_p8 = scmp.lt.s32.totalorder %s1860_s20, 3 }
  0x12   : > { %s2235_s27 = scalar_select %p1973_p5, 1, 0 }
  0x13   : > { %s2236_s28 = scalar_select %p1977_p6, 1, 0 }
  0x14   : > { %p2227_p9 = scmp.eq.s32.totalorder %s1956_s21, 0  ;;  %p1984_p10 = pnand %p1402_p7, %p294_p8 }
  0x15   : > { %s1862_s30 = smov [#allocation5]   ;;  %s1863_s13 = smov [#allocation8]  }
  0x16   : > { %s2237_s29 = scalar_select %p1984_p10, 1, 0 }
  0x17   : > { %s321_s12 = sshll.u32 %s1862_s30, 4  ;;  %p1575_p11 = pneg %p1984_p10  ;;  %s322_s12 = int_to_ptr.vmem [resolvable:$true] %s321_s12 }
  0x18   : > { %s345_s14 = sshll.u32 %s1863_s13, 4  ;;  %s1864_s16 = smov [#allocation2]   ;;  %s346_s14 = int_to_ptr.vmem [resolvable:$true] %s345_s14 }
  0x19   : > { %p1992_p12 = pnand %p2227_p9, %p1575_p11  ;;  %s307_s22 = sshll.u32 %s1864_s16, 4  ;;  %s1996_s22 = int_to_ptr.vmem [resolvable:$true] %s307_s22 }
  0x1a   : > { %s1669_s25 = scalar_lea.vmem %s322_s12, 16  ;;  %s1676_s30 = scalar_lea.vmem %s322_s12, 32 }
  0x1b   : > { %p2000_p13 = pneg %p1992_p12  ;;  %p1670_p0 = scmp.ne.s32.totalorder %s322_s12, %s1669_s25 }
  0x1c   : > { %p1677_p3 = scmp.lt.s32.totalorder %s322_s12, %s322_s12  ;;  %p1678_p4 = scmp.lt.s32.totalorder %s1676_s30, %s1669_s25 }
  0x1d   : > { %p1672_p1 = pnand %p1670_p0, %p2000_p13 }
  0x1e   : > { %p1679_p7 = por %p1678_p4, %p1677_p3 }
  0x1f   : > { %p1673_p2 = pneg %p1672_p1 }
  0x21   : > { %p1680_p8 = pnand %p1679_p7, %p1673_p2 }
  0x23   : > { %1683 = shalt.err (!%p1680_p8)
}
  0x24   : > { %s2240_s3 = sld [smem:[#allocation19_spill]]  ;;  %s1695_s26 = scalar_lea.vmem %s346_s14, 16 }
  0x25   : > { %p1696_p11 = scmp.ne.s32.totalorder %s346_s14, %s1695_s26  ;;  %s1702_s19 = scalar_lea.vmem %s346_s14, 32 }
  0x26   : > { %p1703_p0 = scmp.lt.s32.totalorder %s346_s14, %s346_s14  ;;  %p1704_p1 = scmp.lt.s32.totalorder %s1702_s19, %s1695_s26 }
  0x27   : > { %p1698_p9 = pnand %p1696_p11, %p2000_p13 }
  0x28   : > { %p1705_p5 = por %p1704_p1, %p1703_p0 }
  0x29   : > { %p1699_p6 = pneg %p1698_p9 }
  0x2a   : > { %1581 = dma.hbm_to_vmem [thread:$0]  (!%p1992_p12), %s2240_s3, 16, %s322_s12, [#allocation6]  }
  0x2b   : > { %p1706_p10 = pnand %p1705_p5, %p1699_p6 }
  0x2d   : > { %1709 = shalt.err (!%p1706_p10)
}
  0x2e   : > { %1587 = dma.hbm_to_vmem [thread:$0]  (!%p1992_p12), %s2220_s5, 16, %s346_s14, [#allocation9]  }
  0x2f   : > { %s1721_s12 = scalar_lea.vmem %s1996_s22, 128  ;;  %p1729_p4 = scmp.lt.s32.totalorder %s1996_s22, %s1996_s22 }
  0x30   : > { %p1722_p2 = scmp.ne.s32.totalorder %s1996_s22, %s1721_s12  ;;  %p1730_p7 = scmp.lt.s32.totalorder %s1721_s12, %s1721_s12 }
  0x32   : > { %p1724_p9 = pnand %p1722_p2, %p2000_p13  ;;  %p1731_p5 = por %p1730_p7, %p1729_p4 }
  0x34   : > { %p1725_p3 = pneg %p1724_p9 }
  0x36   : > { %p1732_p6 = pnand %p1731_p5, %p1725_p3 }
  0x38   : > { %1735 = shalt.err (!%p1732_p6)
}
  0x39   : > { %s2241_s1 = sld [smem:[#allocation18_spill]]  ;;  %s1865_s14 = smov [#allocation7]  }
  0x3a   : > { %s331_s13 = sshll.u32 %s1865_s14, 4  ;;  %s332_s13 = int_to_ptr.vmem [resolvable:$true] %s331_s13 }
  0x3b   : > { %s1747_s16 = scalar_lea.vmem %s332_s13, 512  ;;  %p1755_p0 = scmp.lt.s32.totalorder %s332_s13, %s332_s13 }
  0x3c   : > { %p1748_p10 = scmp.ne.s32.totalorder %s332_s13, %s1747_s16  ;;  %p1756_p1 = scmp.lt.s32.totalorder %s1747_s16, %s1747_s16 }
  0x3e   : > { %p1750_p8 = pnand %p1748_p10, %p2000_p13  ;;  %p1757_p2 = por %p1756_p1, %p1755_p0 }
  0x3f   : > { %1578 = dma.hbm_to_vmem [thread:$0]  (!%p1992_p12), %s2241_s1, 128, %s1996_s22, [#allocation3]  }
  0x40   : > { %p1751_p11 = pneg %p1750_p8 }
  0x42   : > { %p1758_p9 = pnand %p1757_p2, %p1751_p11 }
  0x44   : > { %1761 = shalt.err (!%p1758_p9)
}
  0x45   : > { %s1866_s25 = smov 128   ;;  %s1867_s30 = smov 8  }
  0x46   : > { %1584 = dma.hbm_to_vmem [thread:$0]  (!%p1992_p12), %s2219_s4, 512, %s332_s13, [#allocation6], %s1866_s25, %s1866_s25, %s1867_s30  }
  0x47   : > { %s1868_s19 = smov [#allocation10]  }
  0x48   : > { %s362_s26 = sshll.u32 %s1868_s19, 4  ;;  %s363_s26 = int_to_ptr.vmem [resolvable:$true] %s362_s26 }
  0x49   : > { %s1773_s14 = scalar_lea.vmem %s363_s26, 16  ;;  %s1780_s16 = scalar_lea.vmem %s363_s26, 32 }
  0x4a   : > { %p1774_p3 = scmp.ne.s32.totalorder %s363_s26, %s1773_s14  ;;  %p1781_p5 = scmp.lt.s32.totalorder %s363_s26, %s363_s26 }
  0x4b   : > { %p1782_p6 = scmp.lt.s32.totalorder %s1780_s16, %s1773_s14 }
  0x4c   : > { %p1776_p4 = pnand %p1774_p3, %p2000_p13 }
  0x4d   : > { %p1783_p10 = por %p1782_p6, %p1781_p5 }
  0x4e   : > { %p1777_p7 = pneg %p1776_p4 }
  0x50   : > { %p1784_p8 = pnand %p1783_p10, %p1777_p7 }
  0x52   : > { %1787 = shalt.err (!%p1784_p8)
}
  0x53   : > { %1590 = dma.hbm_to_vmem [thread:$0]  (!%p1992_p12), %s2223_s8, 16, %s363_s26, [#allocation9]  }
  0x54   : > { %p2242_p11 = scmp.ne.s32.totalorder %s2237_s29, 0 }
  0x55   : > { %p2243_p0 = scmp.eq.s32.totalorder (!%p2242_p11), %s1956_s21, 0 }
  0x56   : > { %390 = sbr.rel (%p2242_p11) target bundleno = 1373 (0x55d), region = 64 }
  0x5b   : > { %1831 = dma.done.wait (%p2243_p0), [#allocation3], 128   ;;  %p2244_p13 = pmov %p2243_p0 }
  0x5c   : > { %p2245_p1 = pmov %p2243_p0 }
  0x5d   : > { %1833 = vsyncadd (%p2244_p13), [#allocation3], 4294967168 }
  0x5e   : > { %1835 = dma.done.wait (%p2245_p1), [#allocation6], 528   ;;  %p2246_p2 = pmov %p2243_p0 }
  0x5f   : > { %p2247_p9 = pmov %p2243_p0 }
  0x60   : > { %1837 = vsyncadd (%p2246_p2), [#allocation6], 4294966768 }
  0x61   : > { %1839 = dma.done.wait (%p2247_p9), [#allocation9], 32   ;;  %p2248_p12 = pmov %p2243_p0 }
  0x62   : > { %s1416_s1 = sshll.u32 %s1956_s21, 1  ;;  %v1869_v0 = vmov 0.0   ;;  %vm1870_vm0 = vmmov 0   ;;  %vm456_vm1 = vcmask 64512   ;;  %v455_v3 = vld [vmem:[#allocation2] sm:$0xff]  ;;  %v607_v4 = vld [vmem:[%s2217_s2 + $0x18] sm:$0xff] }
  0x63   : > { %1841 = vsyncadd (%p2248_p12), [#allocation9], 4294967264  ;;  %1478 = vmatprep.subr.mxu0 %v1869_v0  ;;  %1483 = vmatprep.subr.mxu1 %v1869_v0  ;;  %p447_p3 = scmp.lt.s32.totalorder %s1416_s1, 3  ;;  %v606_v5 = vld [vmem:[%s2217_s2 + $0x10] sm:$0xff]  ;;  %v605_v6 = vld [vmem:[%s2217_s2 + $0x8] sm:$0xff]  ;;  %vm615_vm2 = vcmask 261120  }
  0x64   : > { %1480 = vmatprep.mubr.msk.f32.mxu0 %vm1870_vm0, %v1869_v0  ;;  %1485 = vmatprep.mubr.msk.f32.mxu1 %vm1870_vm0, %v1869_v0  ;;  %v604_v7 = vld [vmem:[%s2217_s2] sm:$0xff]  ;;  %v812_v16 = vld [vmem:[%s2221_s6 + $0x18] sm:$0xff]  ;;  %v811_v17 = vld [vmem:[%s2221_s6 + $0x10] sm:$0xff]  ;;  %vm733_vm3 = vcmask 1041409   ;;  %v1871_v62 = vmov 1966171168  }
  0x65   : > { %s2257_s1 = smov (!%p447_p3, %s1416_s1), 3  ;;  %v810_v18 = vld [vmem:[%s2221_s6 + $0x8] sm:$0xff]  ;;  %v809_v19 = vld [vmem:[%s2221_s6] sm:$0xff]  ;;  %v721_v22 = vld [vmem:[#allocation7 + $0x8] sm:$0xff]  ;;  %v973_v63 = vunpack.c.l.s4 %v1871_v62  ;;  %s443_s22 = sand.u32 1, %s1852_s18  }
  0x66   : > { %s1417_s3 = sshll.u32 %s2257_s1, 3  ;;  %v723_v20 = vld [vmem:[#allocation7 + $0x18] sm:$0xff]  ;;  %v722_v21 = vld [vmem:[#allocation7 + $0x10] sm:$0xff]  ;;  %v720_v23 = vld [vmem:[#allocation7] sm:$0xff]  ;;  %s1415_s19 = sshll.u32 %s443_s22, 4 }
  0x67   : > { %s450_s24 = scalar_lea.vmem %s2215_s0, %s1417_s3  ;;  %v1420_v24 = vld [vmem:[#allocation5] ss:$0 sm:$0xff]  ;;  %v897_v52 = vld [vmem:[%s2222_s7 + $0x18] sm:$0xff]  ;;  %v896_v53 = vld [vmem:[%s2222_s7 + $0x10] sm:$0xff]  ;;  %s1441_s16 = sshll.u32 %s1956_s21, 8 }
  0x68   : > { %v2068_v1 = vld [vmem:[%s450_s24] sm:$0xff]  ;;  %v2070_v2 = vld [vmem:[%s450_s24 + $0x8] sm:$0xff]  ;;  %s445_s1 = scalar_lea.vmem [#allocation11], %s1415_s19  ;;  %s2169_s24 = scalar_lea.hbm %s2226_s11, %s1441_s16 }
  0x69   : > { %1479 = vmatpush3.msra.mxu0 %v2068_v1  ;;  %1484 = vmatpush3.msra.mxu1 %v2070_v2  ;;  %v895_v54 = vld [vmem:[%s2222_s7 + $0x8] sm:$0xff]  ;;  %v894_v55 = vld [vmem:[%s2222_s7] sm:$0xff]  ;;  %s1289_s3 = sshll.u32 %s445_s1, 4  ;;  %s2175_s21 = scalar_lea.sflag [#allocation4], %s443_s22  ;;  %s2171_s3 = int_to_ptr.vmem [resolvable:$true] %s1289_s3 }
  0x6a   : > { %1481 = vmatmul.mubr.msk.f32.vlgmr.msra.gmra.mxu0 %vm456_vm1, %v455_v3  ;;  %1486 = vmatmul.mubr.msk.f32.vlgmr.msra.gmra.mxu1 %vm456_vm1, %v455_v3  ;;  %v1423_v56 = vld [vmem:[#allocation8] ss:$0 sm:$0xff]  ;;  %s1788_s13 = scalar_lea.vmem %s2171_s3, 256  ;;  %p2249_p7 = scmp.ne.s32.totalorder %s2235_s27, 0 }
  0x6b   : > { %1488 = vmatprep.subr.mxu0 %v607_v4  ;;  %1499 = vmatprep.subr.mxu1 %v1869_v0  ;;  %p1789_p4 = scmp.ne.s32.totalorder %s2171_s3, %s1788_s13  ;;  %s1872_s25 = smov [#allocation11]  }
  0x6c   : > { %1489 = vmatpush3.msra.mxu0 %v607_v4  ;;  %1507 = vmatprep.mubr.msk.f32.mxu1 %vm1870_vm0, %v1869_v0  ;;  %s1792_s30 = sshll.u32 %s1872_s25, 4  ;;  %s1793_s30 = int_to_ptr.vmem [resolvable:$false] %s1792_s30 }
  0x6d   : > { %1490 = vmatprep.subr.mxu0 %v606_v5  ;;  %1500 = vmatpush3.msra.mxu1 %v723_v20  ;;  %p1790_p5 = pnand %p1789_p4, %p2249_p7  ;;  %s1794_s12 = scalar_lea.vmem %s1793_s30, 512 }
  0x6e   : > { %1491 = vmatpush3.msra.mxu0 %v606_v5  ;;  %1501 = vmatprep.subr.mxu1 %v1869_v0  ;;  %p1795_p10 = scmp.lt.s32.totalorder %s2171_s3, %s1793_s30  ;;  %p1796_p8 = scmp.lt.s32.totalorder %s1794_s12, %s1788_s13 }
  0x6f   : > { %1492 = vmatprep.subr.mxu0 %v605_v6  ;;  %1502 = vmatpush3.msra.mxu1 %v722_v21  ;;  %p1791_p6 = pneg %p1790_p5 }
  0x70   : > { %1493 = vmatpush3.msra.mxu0 %v605_v6  ;;  %1503 = vmatprep.subr.mxu1 %v1869_v0  ;;  %p1797_p11 = por %p1796_p8, %p1795_p10 }
  0x71   : > { %1494 = vmatprep.subr.mxu0 %v604_v7  ;;  %1504 = vmatpush3.msra.mxu1 %v721_v22 }
  0x72   : > { %1495 = vmatpush3.msra.mxu0 %v604_v7  ;;  %1505 = vmatprep.subr.mxu1 %v1869_v0  ;;  %p1798_p0 = pnand %p1797_p11, %p1791_p6 }
  0x73   : > { %1510 = vmatprep.subr.mxu0 %v812_v16  ;;  %1506 = vmatpush3.msra.mxu1 %v720_v23 }
  0x74   : > { %1521 = vmatprep.subr.mxu1 %v1869_v0 }
 0x12a   : > { %v526_v8 = vpop.f32.mrf.mxu0  ;;  %v596_v9 = vpop.f32.mrf.mxu1 }
 0x12b   : > { %v600_v10 = vmul.f32 0.2, %v526_v8  ;;  %v601_v11 = vmul.f32 0.2, %v596_v9 }
 0x12c   : > { %v1482_v12 = vpop.f32.mrf.mxu0  ;;  %v1487_v13 = vpop.f32.mrf.mxu1 }
 0x12d   : > { %v602_v14 = vmax.f32 %v526_v8, %v600_v10  ;;  %v603_v15 = vmax.f32 %v596_v9, %v601_v11 }
 0x12f   : > { %1496 = vmatprep.mubr.msk.f32.mxu0 %vm615_vm2, %v602_v14 }
 0x130   : > { %1497 = vmatmul.mubr.msk.f32.vlgmr.msra.gmra.mxu0 %vm615_vm2, %v603_v15  ;;  %v1428_v15 = vld [vmem:[#allocation10] ss:$0 sm:$0xff] }
 0x131   : > { %1511 = vmatpush3.msra.mxu0 %v812_v16 }
 0x132   : > { %1512 = vmatprep.subr.mxu0 %v811_v17 }
 0x133   : > { %1513 = vmatpush3.msra.mxu0 %v811_v17 }
 0x134   : > { %1514 = vmatprep.subr.mxu0 %v810_v18 }
 0x135   : > { %1515 = vmatpush3.msra.mxu0 %v810_v18 }
 0x136   : > { %1516 = vmatprep.subr.mxu0 %v809_v19 }
 0x137   : > { %1517 = vmatpush3.msra.mxu0 %v809_v19 }
 0x1f0   : > { %v1498_v25 = vpop.f32.mrf.mxu0 }
 0x1f1   : > { %v694_v26 = vadd.f32 %v1498_v25, %v1420_v24 }
 0x1f2   : > { %v688_v27 = vpop.f32.mrf.mxu0 }
 0x1f3   : > { %v698_v28 = vmul.f32 0.2, %v694_v26  ;;  %v689_v29 = vadd.f32 %v1420_v24, %v688_v27 }
 0x1f5   : > { %v700_v30 = vmax.f32 %v694_v26, %v698_v28  ;;  %v697_v31 = vmul.f32 0.2, %v689_v29 }
 0x1f7   : > { %v2110_v32 = vadd.f32 %v700_v30, %v2070_v2  ;;  %v699_v33 = vmax.f32 %v689_v29, %v697_v31  ;;  %v974_v2 = vunpack.c.0.s8 %v973_v63  ;;  %v1180_v29 = vld [vmem:[%s2224_s9 + $0x18] sm:$0xff]  ;;  %v1179_v30 = vld [vmem:[%s2224_s9 + $0x10] sm:$0xff]  ;;  %v1178_v31 = vld [vmem:[%s2224_s9 + $0x8] sm:$0xff] }
 0x1f8   : > { %1542 = vmatprep.subr.mxu0 %v1180_v29 }
 0x1f9   : > { %v710_v34 = vsel %vm615_vm2, %v2110_v32, 0.0  ;;  %v701_v35 = vadd.f32 %v699_v33, %v2068_v1  ;;  %v975_v1 = vlaneseq }
 0x1fa   : > { %v711_v36 = vrot.slane %v710_v34, 4 }
 0x1fb   : > { %v703_v37 = vsel %vm615_vm2, %v701_v35, 0.0  ;;  %1518 = vmatprep.mubr.msk.f32.mxu0 %vm615_vm2, %v701_v35  ;;  %v976_v3 = vshrl.u32 %v975_v1, 7 }
 0x1fc   : > { %v712_v38 = vadd.f32 %v711_v36, %v710_v34  ;;  %v704_v39 = vrot.slane %v703_v37, 4  ;;  %1519 = vmatmul.mubr.msk.f32.vlgmr.msra.gmra.mxu0 %vm615_vm2, %v2110_v32 }
 0x1fd   : > { %v977_v4 = vsub.s32 %v974_v2, %v976_v3  ;;  %v996_v7 = vsub.s32 0, %v976_v3  ;;  %1543 = vmatpush3.msra.mxu0 %v1180_v29 }
 0x1fe   : > { %v713_v40 = vrot.slane %v712_v38, 2  ;;  %v705_v41 = vadd.f32 %v704_v39, %v703_v37  ;;  %1544 = vmatprep.subr.mxu0 %v1179_v30 }
 0x1ff   : > { %1545 = vmatpush3.msra.mxu0 %v1179_v30 }
 0x200   : > { %v714_v42 = vadd.f32 %v713_v40, %v712_v38  ;;  %v706_v43 = vrot.slane %v705_v41, 2  ;;  %1546 = vmatprep.subr.mxu0 %v1178_v31  ;;  %v1433_v40 = vld [vmem:[%s2225_s10] ss:$0 sm:$0xff] }
 0x201   : > { %1547 = vmatpush3.msra.mxu0 %v1178_v31 }
 0x202   : > { %v707_v44 = vadd.f32 %v706_v43, %v705_v41  ;;  %v715_v45 = vrot.slane %v714_v42, 1 }
 0x204   : > { %v708_v46 = vrot.slane %v707_v44, 1  ;;  %v716_v47 = vadd.f32 %v715_v45, %v714_v42 }
 0x206   : > { %v709_v48 = vadd.f32 %v708_v46, %v707_v44  ;;  %v719_v50 = vmul.f32 0.125, %v716_v47 }
 0x208   : > { %v718_v49 = vmul.f32 0.125, %v709_v48 }
 0x20a   : > { %v734_v51 = vsel %vm733_vm3, %v719_v50, %v718_v49 }
 0x20b   : > { %1508 = vmatmul.mubr.msk.f32.vlgmr.msra.gmra.mxu1 %vm615_vm2, %v734_v51 }
 0x20c   : > { %1529 = vmatprep.mubr.msk.f32.mxu1 %vm1870_vm0, %v1869_v0  ;;  %1522 = vmatpush3.msra.mxu1 %v897_v52 }
 0x20d   : > { %1523 = vmatprep.subr.mxu1 %v1869_v0 }
 0x20e   : > { %1524 = vmatpush3.msra.mxu1 %v896_v53 }
 0x20f   : > { %1525 = vmatprep.subr.mxu1 %v1869_v0 }
 0x210   : > { %1526 = vmatpush3.msra.mxu1 %v895_v54 }
 0x211   : > { %1527 = vmatprep.subr.mxu1 %v1869_v0 }
 0x212   : > { %1528 = vmatpush3.msra.mxu1 %v894_v55 }
 0x213   : > { %1532 = vmatprep.subr.mxu1 %v1869_v0 }
 0x2bc   : > { %v1520_v8 = vpop.f32.mrf.mxu0 }
 0x2be   : > { %v885_v14 = vpop.f32.mrf.mxu0 }
 0x2cb   : > { %v803_v57 = vpop.f32.mrf.mxu1 }
 0x2cc   : > { %v804_v58 = vadd.f32 %v1423_v56, %v803_v57 }
 0x2cd   : > { %v1509_v59 = vpop.f32.mrf.mxu1 }
 0x2ce   : > { %v807_v60 = vmul.f32 0.2, %v804_v58 }
 0x2d0   : > { %v808_v61 = vmax.f32 %v804_v58, %v807_v60 }
 0x2d2   : > { %1530 = vmatmul.mubr.msk.f32.vlgmr.msra.gmra.mxu1 %vm615_vm2, %v808_v61 }
 0x2d3   : > { %1533 = vmatpush3.msra.mxu1 %v701_v35  ;;  %1534 = vmatprep.mubr.msk.f32.mxu1 %vm1870_vm0, %v1869_v0 }
 0x2d4   : > { %1537 = vmatprep.subr.mxu1 %v1869_v0 }
 0x392   : > { %v967_v5 = vpop.f32.mrf.mxu1 }
 0x393   : > { %v978_v6 = vrot.slane %v967_v5, %v977_v4 }
 0x394   : > { %v1531_v9 = vpop.f32.mrf.mxu1 }
 0x395   : > { %v979_v10 = vcombine.high %v978_v6, %v978_v6  ;;  %v986_v11 = vrot.slane %v978_v6, %v977_v4 }
 0x397   : > { %v993_v12 = vrot.slane %v979_v10, %v977_v4  ;;  %v997_v13 = vrot.slane %v986_v11, %v996_v7 }
 0x399   : > { %v1001_v16 = vrot.slane %v993_v12, %v996_v7  ;;  %v1004_v17 = vadd.f32 %v997_v13, %v885_v14 }
 0x39b   : > { %v1005_v18 = vadd.f32 %v1520_v8, %v1001_v16  ;;  %v1013_v19 = vadd.f32 %v1428_v15, %v1004_v17 }
 0x39d   : > { %v1014_v20 = vadd.f32 %v1428_v15, %v1005_v18  ;;  %v1429_v21 = vmul.f32 -1.442695, %v1013_v19 }
 0x39f   : > { %1650 = vpow2.f32 %v1429_v21  ;;  %v1430_v22 = vmul.f32 -1.442695, %v1014_v20 }
 0x3a1   : > { %1652 = vpow2.f32 %v1430_v22 }
 0x3ac   : > { %v1651_v23 = vpop.eup %1650 }
 0x3ad   : > { %v1021_v24 = vadd.f32 1.0, %v1651_v23 }
 0x3ae   : > { %v1653_v25 = vpop.eup %1652 }
 0x3af   : > { %v1022_v26 = vadd.f32 1.0, %v1653_v25  ;;  %1654 = vrcp.f32 %v1021_v24 }
 0x3b1   : > { %1656 = vrcp.f32 %v1022_v26 }
 0x3bc   : > { %v1655_v27 = vpop.eup %1654 }
 0x3bd   : > { %1535 = vmatmul.mubr.msk.f32.vlgmr.msra.gmra.mxu1 %vm456_vm1, %v1655_v27 }
 0x3be   : > { %1538 = vmatpush3.msra.mxu1 %v2110_v32  ;;  %1539 = vmatprep.mubr.msk.f32.mxu1 %vm1870_vm0, %v1869_v0  ;;  %v1657_v28 = vpop.eup %1656  ;;  %v1177_v0 = vld [vmem:[%s2224_s9] sm:$0xff] }
 0x3bf   : > { %1548 = vmatprep.subr.mxu0 %v1177_v0 }
 0x3c0   : > { %1549 = vmatpush3.msra.mxu0 %v1177_v0 }
 0x3c1   : > { %1540 = vmatmul.mubr.msk.f32.vlgmr.msra.gmra.mxu1 %vm456_vm1, %v1657_v28 }
 0x47d   : > { %v1096_v32 = vpop.f32.mrf.mxu1 }
 0x47e   : > { %v1173_v33 = vmul.f32 0.2, %v1096_v32 }
 0x47f   : > { %v1536_v34 = vpop.f32.mrf.mxu1 }
 0x480   : > { %v1175_v35 = vmax.f32 %v1096_v32, %v1173_v33 }
 0x481   : > { %v1169_v36 = vpop.f32.mrf.mxu1 }
 0x482   : > { %v1174_v37 = vmul.f32 0.2, %v1169_v36  ;;  %1550 = vmatprep.mubr.msk.f32.mxu0 %vm615_vm2, %v1175_v35 }
 0x483   : > { %v1541_v38 = vpop.f32.mrf.mxu1 }
 0x484   : > { %v1176_v39 = vmax.f32 %v1169_v36, %v1174_v37 }
 0x486   : > { %1551 = vmatmul.mubr.msk.f32.vlgmr.msra.gmra.mxu0 %vm615_vm2, %v1176_v39 }
 0x546   : > { %v1552_v41 = vpop.f32.mrf.mxu0 }
 0x547   : > { %v1266_v42 = vadd.f32 %v1552_v41, %v1433_v40 }
 0x548   : > { %v1260_v43 = vpop.f32.mrf.mxu0 }
 0x549   : > { %v1270_v44 = vmul.f32 0.2, %v1266_v42  ;;  %v1261_v45 = vadd.f32 %v1433_v40, %v1260_v43 }
 0x54b   : > { %v1272_v46 = vmax.f32 %v1266_v42, %v1270_v44  ;;  %v1269_v47 = vmul.f32 0.2, %v1261_v45 }
 0x54d   : > { %1274 = vst.msk [vmem:[%s445_s1 + $0x8] sm:$0xff] %vm615_vm2, %v1272_v46  ;;  %v1271_v48 = vmax.f32 %v1261_v45, %v1269_v47 }
 0x54f   : > { %1273 = vst.msk [vmem:[%s445_s1] sm:$0xff] %vm615_vm2, %v1271_v48 }
 0x550   : > { %1801 = shalt.err (!%p1798_p0)
}
 0x551   : > { %s1802_s22 = scalar_lea.hbm %s2169_s24, 256  ;;  %s1806_s14 = scalar_lea.hbm %s2226_s11, 512 }
 0x552   : > { %p1803_p13 = scmp.ne.s32.totalorder %s2169_s24, %s1802_s22  ;;  %p1807_p9 = scmp.lt.s32.totalorder %s2169_s24, %s2226_s11 }
 0x553   : > { %p1808_p12 = scmp.lt.s32.totalorder %s1806_s14, %s1802_s22 }
 0x554   : > { %p1804_p1 = pnand %p1803_p13, %p2249_p7 }
 0x555   : > { %p1809_p3 = por %p1808_p12, %p1807_p9 }
 0x556   : > { %p1805_p2 = pneg %p1804_p1 }
 0x558   : > { %p1810_p4 = pnand %p1809_p3, %p1805_p2 }
 0x55a   : > { %1813 = shalt.err (!%p1810_p4)
}
 0x55b   : > { %s1873_s29 = smov 128   ;;  %s1874_s15 = smov 8  }
 0x55c   : > { %1573 = dma.vmem_to_hbm [thread:$0]  (%p2249_p7), %s2171_s3, 256, %s2169_s24, %s2175_s21, %s1873_s29, %s1873_s29, %s1874_s15  }
 0x55d PF: > { %p1605_p5 = scmp.ge.s32.totalorder %s1860_s20, 2  ;;  %s1304_s13 = sand.u32 1, %s1848_s17  }
 0x55e   : > { %p2250_p6 = scmp.ne.s32.totalorder %s2236_s28, 0  ;;  %s1305_s25 = scalar_lea.sflag [#allocation4], %s1304_s13 }
 0x560   : > { %p1592_p10 = pnand %p1605_p5, %p2250_p6 }
 0x562   : > { %p1593_p8 = pneg %p1592_p10 }
 0x564   : > { %1843 = dma.done.wait (%p1593_p8), %s1305_s25, 256  }
 0x565   : > { %1845 = vsyncadd (%p1593_p8), %s1305_s25, 4294967040  ;;  %s2251_s30 = sld [smem:[#allocation16_spill]]  ;;  %p24_p11 = scmp.ge.s32.totalorder %s1960_s23, 4  }
 0x566   : > { %s2252_s19 = sld [smem:[#allocation17_spill]]  ;;  %s2253_s17 = smov %s1852_s18 }
 0x567   : > { %s2255_s20 = smov %s1960_s23  ;;  %26 = sbr.rel (!%p24_p11) target bundleno = 9 (0x9), region = 120 }
 0x56b   : > { %s2254_s18 = smov %s2251_s30 }
 0x56c   :  { %1310 = vsyncpa [#allocation3], 1 }
 0x56d   :  { %1312 = vsyncpa [#allocation3 + $0x1], 1 }
 0x56e   :  { %1313 = vsyncpa [#allocation6], 1 }
 0x56f   :  { %1314 = vsyncpa [#allocation9], 1 }
 0x570   :  { %1315 = vsyncpa [#allocation4], 1 }
 0x571   :  { %1317 = vsyncpa [#allocation4 + $0x1], 1 }

</bundles_post_ra>
